<compile_context>
chip_gen: v5e
topology: v5e:2x2
jax: 0.10.0
libtpu: 0.0.40
codegen_flags: <defaults>
</compile_context>

<pallas_src>
import math
import jax
import jax.numpy as jnp
from jax.experimental import pallas as pl
from jax.experimental.pallas import tpu as pltpu

# --- small synthetic model dims (real model: H=768, 12 layers, 12 heads) ---
B = 2          # batch
S = 8          # sequence length
H = 32         # hidden size
NUM_HEADS = 2
DH = H // NUM_HEADS
FFN = 64
VOCAB = 100
TYPE_VOCAB = 2
N_LAYERS = 2
LN_EPS = 1e-12          # matches torch/electra default (effectively 0 in fp32)
BS = B * S


def _layer_norm(x, gamma, beta, eps=LN_EPS):
    mu = jnp.mean(x, axis=-1, keepdims=True)
    var = jnp.mean((x - mu) ** 2, axis=-1, keepdims=True)
    return (x - mu) * jax.lax.rsqrt(var + eps) * gamma + beta


# ---------------------------------------------------------------------------
# Single fused Pallas kernel: embedding LayerNorm -> N_LAYERS encoder layers
# -> WiC row gather + concat Linear.  No grid; everything resident in VMEM.
# ---------------------------------------------------------------------------
def fused_forward_kernel(tok_ref,                       # SMEM (B,) int32
                         x_ref, bias_ref, embln_ref,
                         wqkv_ref, bqkv_ref, wo_ref, vecs_ref,
                         w1_ref, b1_ref, w2_ref, wc_ref, bc_ref,
                         out_ref, xs_ref):
    # ---- embedding LayerNorm (batch collapsed to one (B*S, H) slab) --------
    x = _layer_norm(x_ref[...], embln_ref[0:1, :], embln_ref[1:2, :])   # (BS,H)

    # Additive attention bias (block-diag over batch + key padding) is built
    # once per forward in the wrapper; loaded once and reused by all layers.
    bias = bias_ref[...]                                                # (BS,BS)

    # ---- transformer encoder layers (static unroll; weights stay in VMEM) --
    for l in range(N_LAYERS):
        vec = vecs_ref[l]                       # (6, H): bo,g1,be1,b2,g2,be2
        bo, g1, be1 = vec[0:1, :], vec[1:2, :], vec[2:3, :]
        b2, g2, be2 = vec[3:4, :], vec[4:5, :], vec[5:6, :]

        # One packed, lane-dense QKV projection (Q columns pre-scaled by
        # 1/sqrt(DH) at init): (BS,H) @ (H,3H) -> (BS,3H).
        qkv = jnp.dot(x, wqkv_ref[l],
                      preferred_element_type=jnp.float32) + bqkv_ref[l]

        attn = bo                                                       # (1,H)
        for n in range(NUM_HEADS):
            qn = qkv[:, n * DH:(n + 1) * DH]                            # (BS,DH)
            kn = qkv[:, H + n * DH: H + (n + 1) * DH]
            vn = qkv[:, 2 * H + n * DH: 2 * H + (n + 1) * DH]

            s = jnp.einsum('qd,kd->qk', qn, kn,
                           preferred_element_type=jnp.float32) + bias   # (BS,BS)
            m = jnp.max(s, axis=-1, keepdims=True)
            e = jnp.exp(s - m)
            p = e * pl.reciprocal(jnp.sum(e, axis=-1, keepdims=True),
                                  approx=True)
            ctx = jnp.dot(p, vn, preferred_element_type=jnp.float32)    # (BS,DH)
            # Head-merge as accumulated (BS,DH)@(DH,H) dots (NH=2, negligible;
            # at NH=12 this would become one 'nqd,ndh->qh' contraction).
            attn = attn + jnp.dot(ctx, wo_ref[l, n],
                                  preferred_element_type=jnp.float32)

        h1 = _layer_norm(x + attn, g1, be1)

        ff = jnp.dot(h1, w1_ref[l], preferred_element_type=jnp.float32) + b1_ref[l]
        ff = jax.nn.gelu(ff)   # TODO(synk): HF ELECTRA uses exact erf gelu
        ff = jnp.dot(ff, w2_ref[l], preferred_element_type=jnp.float32) + b2
        x = _layer_norm(h1 + ff, g2, be2)

    # ---- WiC head: rows tok-1..tok+1 per batch, concat-Linear(3H -> H) -----
    # Stage the final hidden slab into VMEM scratch, then gather rows with
    # scalar-driven dynamic sublane slices (tok is in SMEM).  The concat
    # Linear decomposes exactly as  sum_j  row_j @ Wc[j*H:(j+1)*H, :].
    xs_ref[...] = x
    bc = bc_ref[...]                                                    # (1,H)
    for b in range(B):
        t = tok_ref[b]                       # scalar (pre-clamped in wrapper)
        start = b * S + t - 1
        r = bc
        for j in range(3):
            row = xs_ref[pl.ds(start + j, 1), :]                        # (1,H)
            r = r + jnp.dot(row, wc_ref[j], preferred_element_type=jnp.float32)
        # NOTE: reference applies self.relu(output) but discards the result,
        # so the returned tensor is intentionally NOT relu-activated.
        out_ref[b:b + 1, :] = r


def fused_forward(tok, x2, bias, kp):
    vmem = pl.BlockSpec(memory_space=pltpu.MemorySpace.VMEM)
    smem = pl.BlockSpec(memory_space=pltpu.MemorySpace.SMEM)
    return pl.pallas_call(
        fused_forward_kernel,
        out_shape=jax.ShapeDtypeStruct((B, H), jnp.float32),
        in_specs=[smem] + [vmem] * 12,
        out_specs=vmem,
        scratch_shapes=[pltpu.VMEM((BS, H), jnp.float32)],
        # No grid: one step, ~60 KB of data fully VMEM-resident.
    )(tok, x2, bias,
      kp['embln'], kp['wqkv'], kp['bqkv'], kp['wo'], kp['vecs'],
      kp['w1'], kp['b1'], kp['w2'], kp['wc'], kp['bc'])


# ---------------------------------------------------------------------------
# Parameter init (deterministic, synthetic, torch-like layout) and the
# one-time reparameterization into kernel-ready packed weights.
# ---------------------------------------------------------------------------
def init_params(key):
    keys = iter(jax.random.split(key, 64))

    def nrm(shape, scale=0.02):
        return (scale * jax.random.normal(next(keys), shape)).astype(jnp.float32)

    params = {
        'word_emb': nrm((VOCAB, H)),
        'type_emb': nrm((TYPE_VOCAB, H)),
        'pos_emb': nrm((S, H)),
        'emb_g': jnp.ones((1, H), jnp.float32),
        'emb_b': jnp.zeros((1, H), jnp.float32),
        'w_concat': nrm((3 * H, H)),            # liearConcat: Linear(3H -> H)
        'b_concat': jnp.zeros((1, H), jnp.float32),
        'layers': [],
    }
    for _ in range(N_LAYERS):
        params['layers'].append({
            'wq': nrm((H, H)), 'bq': jnp.zeros((1, H), jnp.float32),
            'wk': nrm((H, H)), 'bk': jnp.zeros((1, H), jnp.float32),
            'wv': nrm((H, H)), 'bv': jnp.zeros((1, H), jnp.float32),
            'wo': nrm((H, H)), 'bo': jnp.zeros((1, H), jnp.float32),
            'g1': jnp.ones((1, H), jnp.float32), 'be1': jnp.zeros((1, H), jnp.float32),
            'w1': nrm((H, FFN)), 'b1': jnp.zeros((1, FFN), jnp.float32),
            'w2': nrm((FFN, H)), 'b2': jnp.zeros((1, H), jnp.float32),
            'g2': jnp.ones((1, H), jnp.float32), 'be2': jnp.zeros((1, H), jnp.float32),
        })
    return params


def prepare_kernel_params(params):
    """Exact reparameterization of the Linear layers for the fused kernel,
    done once at init (layout plumbing):
      * Q|K|V column-packed into one (L, H, 3H) weight and (L, 1, 3H) bias,
        with the 1/sqrt(DH) attention scale folded into the Q columns/bias.
      * output-projection row blocks split per head -> (L, NH, DH, H).
      * all H-wide per-layer vectors packed into a single (L, 6, H) tensor.
      * embedding-LN gamma/beta packed into one (2, H) tensor.
    TODO(synk): at real scale the packed matmul weights would be cast to
    bf16 here (keeping f32 accumulation / LN / softmax)."""
    layers = params['layers']
    scale = 1.0 / math.sqrt(DH)

    wqkv = jnp.stack([jnp.concatenate(
        [lp['wq'] * scale, lp['wk'], lp['wv']], axis=1) for lp in layers])   # (L,H,3H)
    bqkv = jnp.stack([jnp.concatenate(
        [lp['bq'] * scale, lp['bk'], lp['bv']], axis=1) for lp in layers])   # (L,1,3H)
    wo = jnp.stack([lp['wo'].reshape(NUM_HEADS, DH, H) for lp in layers])    # (L,NH,DH,H)
    vecs = jnp.stack([jnp.concatenate(
        [lp['bo'], lp['g1'], lp['be1'], lp['b2'], lp['g2'], lp['be2']],
        axis=0) for lp in layers])                                           # (L,6,H)
    return {
        'embln': jnp.concatenate([params['emb_g'], params['emb_b']], axis=0),  # (2,H)
        'wqkv': wqkv, 'bqkv': bqkv, 'wo': wo, 'vecs': vecs,
        'w1': jnp.stack([lp['w1'] for lp in layers]),
        'b1': jnp.stack([lp['b1'] for lp in layers]),
        'w2': jnp.stack([lp['w2'] for lp in layers]),
        'wc': params['w_concat'].reshape(3, H, H),   # concat-Linear row blocks
        'bc': params['b_concat'],
    }


# ---------------------------------------------------------------------------
# Full forward pass.
# ---------------------------------------------------------------------------
def forward(params, kparams, input_ids, token_type_ids, attention_mask,
            tok_start, tok_end):
    del tok_end  # unused by the reference module's active code path
    iids = input_ids.astype(jnp.int32)
    tids = token_type_ids.astype(jnp.int32)
    amask = attention_mask.astype(jnp.float32)                        # (B, S)

    # Embedding table lookups (plain-JAX gathers; LayerNorm runs in-kernel).
    x = (params['word_emb'][iids] + params['type_emb'][tids]
         + params['pos_emb'][None, :, :])                             # (B, S, H)
    x2 = x.reshape(BS, H)

    # Additive attention bias over the collapsed batch: block-diagonal across
    # batch elements plus the key-padding mask.  Built once per forward and
    # reused by every encoder layer and head inside the fused kernel.
    # TODO(synk): at real B*S this dense (BS,BS) form is quadratic — switch to
    # a per-batch (B,S,S) mask and batch the attention over B instead.
    bid = jnp.repeat(jnp.arange(B, dtype=jnp.int32), S)               # (BS,)
    keep = (bid[:, None] == bid[None, :]) & (amask.reshape(-1)[None, :] > 0)
    bias = jnp.where(keep, 0.0, -1e9).astype(jnp.float32)             # (BS, BS)

    # Guard the s-1..s+1 gather window (semantic guard; reference would
    # wrap/raise for out-of-range indices).
    tok = jnp.clip(tok_start.astype(jnp.int32), 1, S - 2)             # (B,)
    return fused_forward(tok, x2, bias, kparams)


if __name__ == "__main__":
    key = jax.random.PRNGKey(0)
    pkey, ikey, tkey = jax.random.split(key, 3)

    params = init_params(pkey)
    kparams = prepare_kernel_params(params)

    input_ids = jax.random.randint(ikey, (B, S), 0, VOCAB)
    token_type_ids = jnp.zeros((B, S), jnp.int32)
    attention_mask = jnp.ones((B, S), jnp.int32)
    tokIdx_start = jax.random.randint(tkey, (B,), 1, S - 1)  # keep s-1..s+1 in range
    tokIdx_end = tokIdx_start                                # unused by forward

    out = jax.jit(forward)(params, kparams, input_ids, token_type_ids,
                           attention_mask, tokIdx_start, tokIdx_end)
    jax.block_until_ready(out)
    assert out.shape == (B, H) and out.dtype == jnp.float32
    print("KERNEL_OK")
</pallas_src>

<mosaic_0001>
module attributes {stable_mosaic.version = 11 : i64} {
  func.func @fused_forward_kernel(%arg0: memref<2xi32, #tpu.memory_space<smem>>, %arg1: memref<16x32xf32, #tpu.memory_space<vmem>>, %arg2: memref<16x16xf32, #tpu.memory_space<vmem>>, %arg3: memref<2x32xf32, #tpu.memory_space<vmem>>, %arg4: memref<2x32x96xf32, #tpu.memory_space<vmem>>, %arg5: memref<2x1x96xf32, #tpu.memory_space<vmem>>, %arg6: memref<2x2x16x32xf32, #tpu.memory_space<vmem>>, %arg7: memref<2x6x32xf32, #tpu.memory_space<vmem>>, %arg8: memref<2x32x64xf32, #tpu.memory_space<vmem>>, %arg9: memref<2x1x64xf32, #tpu.memory_space<vmem>>, %arg10: memref<2x64x32xf32, #tpu.memory_space<vmem>>, %arg11: memref<3x32x32xf32, #tpu.memory_space<vmem>>, %arg12: memref<1x32xf32, #tpu.memory_space<vmem>>, %arg13: memref<2x32xf32, #tpu.memory_space<vmem>>, %arg14: memref<16x32xf32, #tpu.memory_space<vmem>>) attributes {dimension_semantics = [], scalar_prefetch = 0 : i64, scratch_operands = 1 : i64, tpu.core_type = #tpu.core_type<tc>} {
    %c0 = arith.constant 0 : index
    %c0_0 = arith.constant 0 : index
    %0 = vector.load %arg1[%c0, %c0_0] : memref<16x32xf32, #tpu.memory_space<vmem>>, vector<16x32xf32>
    %c0_1 = arith.constant 0 : index
    %c0_2 = arith.constant 0 : index
    %1 = vector.load %arg3[%c0_1, %c0_2] : memref<2x32xf32, #tpu.memory_space<vmem>>, vector<1x32xf32>
    %c1 = arith.constant 1 : index
    %c0_3 = arith.constant 0 : index
    %2 = vector.load %arg3[%c1, %c0_3] : memref<2x32xf32, #tpu.memory_space<vmem>>, vector<1x32xf32>
    %cst = arith.constant dense<0.000000e+00> : vector<16xf32>
    %3 = vector.multi_reduction <add>, %0, %cst [1] : vector<16x32xf32> to vector<16xf32>
    %4 = vector.shape_cast %3 : vector<16xf32> to vector<16x1xf32>
    %cst_4 = arith.constant 3.200000e+01 : f32
    %5 = vector.broadcast %cst_4 : f32 to vector<16x1xf32>
    %6 = arith.divf %4, %5 : vector<16x1xf32>
    %7 = vector.broadcast %6 : vector<16x1xf32> to vector<16x32xf32>
    %8 = arith.subf %0, %7 : vector<16x32xf32>
    %9 = arith.mulf %8, %8 : vector<16x32xf32>
    %cst_5 = arith.constant dense<0.000000e+00> : vector<16xf32>
    %10 = vector.multi_reduction <add>, %9, %cst_5 [1] : vector<16x32xf32> to vector<16xf32>
    %11 = vector.shape_cast %10 : vector<16xf32> to vector<16x1xf32>
    %cst_6 = arith.constant 3.200000e+01 : f32
    %12 = vector.broadcast %cst_6 : f32 to vector<16x1xf32>
    %13 = arith.divf %11, %12 : vector<16x1xf32>
    %14 = vector.broadcast %6 : vector<16x1xf32> to vector<16x32xf32>
    %15 = arith.subf %0, %14 : vector<16x32xf32>
    %cst_7 = arith.constant 9.99999996E-13 : f32
    %16 = vector.broadcast %cst_7 : f32 to vector<16x1xf32>
    %17 = arith.addf %13, %16 : vector<16x1xf32>
    %18 = math.rsqrt %17 : vector<16x1xf32>
    %19 = vector.broadcast %18 : vector<16x1xf32> to vector<16x32xf32>
    %20 = arith.mulf %15, %19 : vector<16x32xf32>
    %21 = vector.broadcast %1 : vector<1x32xf32> to vector<16x32xf32>
    %22 = arith.mulf %20, %21 : vector<16x32xf32>
    %23 = vector.broadcast %2 : vector<1x32xf32> to vector<16x32xf32>
    %24 = arith.addf %22, %23 : vector<16x32xf32>
    %c0_8 = arith.constant 0 : index
    %c0_9 = arith.constant 0 : index
    %25 = vector.load %arg2[%c0_8, %c0_9] : memref<16x16xf32, #tpu.memory_space<vmem>>, vector<16x16xf32>
    %c0_10 = arith.constant 0 : index
    %c0_11 = arith.constant 0 : index
    %c0_12 = arith.constant 0 : index
    %26 = vector.load %arg7[%c0_10, %c0_11, %c0_12] : memref<2x6x32xf32, #tpu.memory_space<vmem>>, vector<1x6x32xf32>
    %27 = vector.shape_cast %26 : vector<1x6x32xf32> to vector<6x32xf32>
    %28 = vector.extract_strided_slice %27 {offsets = [0, 0], sizes = [1, 32], strides = [1, 1]} : vector<6x32xf32> to vector<1x32xf32>
    %29 = vector.extract_strided_slice %27 {offsets = [1, 0], sizes = [1, 32], strides = [1, 1]} : vector<6x32xf32> to vector<1x32xf32>
    %30 = vector.extract_strided_slice %27 {offsets = [2, 0], sizes = [1, 32], strides = [1, 1]} : vector<6x32xf32> to vector<1x32xf32>
    %31 = vector.extract_strided_slice %27 {offsets = [3, 0], sizes = [1, 32], strides = [1, 1]} : vector<6x32xf32> to vector<1x32xf32>
    %32 = vector.extract_strided_slice %27 {offsets = [4, 0], sizes = [1, 32], strides = [1, 1]} : vector<6x32xf32> to vector<1x32xf32>
    %33 = vector.extract_strided_slice %27 {offsets = [5, 0], sizes = [1, 32], strides = [1, 1]} : vector<6x32xf32> to vector<1x32xf32>
    %c0_13 = arith.constant 0 : index
    %c0_14 = arith.constant 0 : index
    %c0_15 = arith.constant 0 : index
    %34 = vector.load %arg4[%c0_13, %c0_14, %c0_15] : memref<2x32x96xf32, #tpu.memory_space<vmem>>, vector<1x32x96xf32>
    %35 = vector.shape_cast %34 : vector<1x32x96xf32> to vector<32x96xf32>
    %cst_16 = arith.constant dense<0.000000e+00> : vector<16x96xf32>
    %36 = tpu.matmul %24, %35, %cst_16 {dimension_numbers = #tpu.dot_dimension_numbers<[1], [0], [0], [1], [0, 0, 1, 1], [], []>} : vector<16x32xf32>, vector<32x96xf32>, vector<16x96xf32> -> vector<16x96xf32>
    %c0_17 = arith.constant 0 : index
    %c0_18 = arith.constant 0 : index
    %c0_19 = arith.constant 0 : index
    %37 = vector.load %arg5[%c0_17, %c0_18, %c0_19] : memref<2x1x96xf32, #tpu.memory_space<vmem>>, vector<1x1x96xf32>
    %38 = vector.shape_cast %37 : vector<1x1x96xf32> to vector<1x96xf32>
    %39 = vector.broadcast %38 : vector<1x96xf32> to vector<16x96xf32>
    %40 = arith.addf %36, %39 : vector<16x96xf32>
    %41 = vector.extract_strided_slice %40 {offsets = [0, 0], sizes = [16, 16], strides = [1, 1]} : vector<16x96xf32> to vector<16x16xf32>
    %42 = vector.extract_strided_slice %40 {offsets = [0, 32], sizes = [16, 16], strides = [1, 1]} : vector<16x96xf32> to vector<16x16xf32>
    %43 = vector.extract_strided_slice %40 {offsets = [0, 64], sizes = [16, 16], strides = [1, 1]} : vector<16x96xf32> to vector<16x16xf32>
    "tpu.trace_start"() <{level = 10 : i32, message = "qd,kd->qk"}> : () -> ()
    %cst_20 = arith.constant dense<0.000000e+00> : vector<16x16xf32>
    %44 = tpu.matmul %41, %42, %cst_20 {dimension_numbers = #tpu.dot_dimension_numbers<[1], [1], [0], [0], [0, 0, 1, 0], [], []>} : vector<16x16xf32>, vector<16x16xf32>, vector<16x16xf32> -> vector<16x16xf32>
    "tpu.trace_stop"() : () -> ()
    %45 = arith.addf %44, %25 : vector<16x16xf32>
    %cst_21 = arith.constant dense<0xFF800000> : vector<16xf32>
    %46 = vector.multi_reduction <maximumf>, %45, %cst_21 [1] : vector<16x16xf32> to vector<16xf32>
    %47 = vector.shape_cast %46 : vector<16xf32> to vector<16x1xf32>
    %48 = vector.broadcast %47 : vector<16x1xf32> to vector<16x16xf32>
    %49 = arith.subf %45, %48 : vector<16x16xf32>
    %50 = math.exp %49 : vector<16x16xf32>
    %cst_22 = arith.constant dense<0.000000e+00> : vector<16xf32>
    %51 = vector.multi_reduction <add>, %50, %cst_22 [1] : vector<16x16xf32> to vector<16xf32>
    %52 = vector.shape_cast %51 : vector<16xf32> to vector<16x1xf32>
    %53 = tpu.reciprocal %52 {approx = true} : vector<16x1xf32> -> vector<16x1xf32>
    %54 = vector.broadcast %53 : vector<16x1xf32> to vector<16x16xf32>
    %55 = arith.mulf %50, %54 : vector<16x16xf32>
    %cst_23 = arith.constant dense<0.000000e+00> : vector<16x16xf32>
    %56 = tpu.matmul %55, %43, %cst_23 {dimension_numbers = #tpu.dot_dimension_numbers<[1], [0], [0], [1], [0, 0, 1, 1], [], []>} : vector<16x16xf32>, vector<16x16xf32>, vector<16x16xf32> -> vector<16x16xf32>
    %c0_24 = arith.constant 0 : index
    %c0_25 = arith.constant 0 : index
    %c0_26 = arith.constant 0 : index
    %c0_27 = arith.constant 0 : index
    %57 = vector.load %arg6[%c0_24, %c0_25, %c0_26, %c0_27] : memref<2x2x16x32xf32, #tpu.memory_space<vmem>>, vector<1x1x16x32xf32>
    %58 = vector.shape_cast %57 : vector<1x1x16x32xf32> to vector<16x32xf32>
    %cst_28 = arith.constant dense<0.000000e+00> : vector<16x32xf32>
    %59 = tpu.matmul %56, %58, %cst_28 {dimension_numbers = #tpu.dot_dimension_numbers<[1], [0], [0], [1], [0, 0, 1, 1], [], []>} : vector<16x16xf32>, vector<16x32xf32>, vector<16x32xf32> -> vector<16x32xf32>
    %60 = vector.broadcast %28 : vector<1x32xf32> to vector<16x32xf32>
    %61 = arith.addf %60, %59 : vector<16x32xf32>
    %62 = vector.extract_strided_slice %40 {offsets = [0, 16], sizes = [16, 16], strides = [1, 1]} : vector<16x96xf32> to vector<16x16xf32>
    %63 = vector.extract_strided_slice %40 {offsets = [0, 48], sizes = [16, 16], strides = [1, 1]} : vector<16x96xf32> to vector<16x16xf32>
    %64 = vector.extract_strided_slice %40 {offsets = [0, 80], sizes = [16, 16], strides = [1, 1]} : vector<16x96xf32> to vector<16x16xf32>
    "tpu.trace_start"() <{level = 10 : i32, message = "qd,kd->qk"}> : () -> ()
    %cst_29 = arith.constant dense<0.000000e+00> : vector<16x16xf32>
    %65 = tpu.matmul %62, %63, %cst_29 {dimension_numbers = #tpu.dot_dimension_numbers<[1], [1], [0], [0], [0, 0, 1, 0], [], []>} : vector<16x16xf32>, vector<16x16xf32>, vector<16x16xf32> -> vector<16x16xf32>
    "tpu.trace_stop"() : () -> ()
    %66 = arith.addf %65, %25 : vector<16x16xf32>
    %cst_30 = arith.constant dense<0xFF800000> : vector<16xf32>
    %67 = vector.multi_reduction <maximumf>, %66, %cst_30 [1] : vector<16x16xf32> to vector<16xf32>
    %68 = vector.shape_cast %67 : vector<16xf32> to vector<16x1xf32>
    %69 = vector.broadcast %68 : vector<16x1xf32> to vector<16x16xf32>
    %70 = arith.subf %66, %69 : vector<16x16xf32>
    %71 = math.exp %70 : vector<16x16xf32>
    %cst_31 = arith.constant dense<0.000000e+00> : vector<16xf32>
    %72 = vector.multi_reduction <add>, %71, %cst_31 [1] : vector<16x16xf32> to vector<16xf32>
    %73 = vector.shape_cast %72 : vector<16xf32> to vector<16x1xf32>
    %74 = tpu.reciprocal %73 {approx = true} : vector<16x1xf32> -> vector<16x1xf32>
    %75 = vector.broadcast %74 : vector<16x1xf32> to vector<16x16xf32>
    %76 = arith.mulf %71, %75 : vector<16x16xf32>
    %cst_32 = arith.constant dense<0.000000e+00> : vector<16x16xf32>
    %77 = tpu.matmul %76, %64, %cst_32 {dimension_numbers = #tpu.dot_dimension_numbers<[1], [0], [0], [1], [0, 0, 1, 1], [], []>} : vector<16x16xf32>, vector<16x16xf32>, vector<16x16xf32> -> vector<16x16xf32>
    %c0_33 = arith.constant 0 : index
    %c1_34 = arith.constant 1 : index
    %c0_35 = arith.constant 0 : index
    %c0_36 = arith.constant 0 : index
    %78 = vector.load %arg6[%c0_33, %c1_34, %c0_35, %c0_36] : memref<2x2x16x32xf32, #tpu.memory_space<vmem>>, vector<1x1x16x32xf32>
    %79 = vector.shape_cast %78 : vector<1x1x16x32xf32> to vector<16x32xf32>
    %cst_37 = arith.constant dense<0.000000e+00> : vector<16x32xf32>
    %80 = tpu.matmul %77, %79, %cst_37 {dimension_numbers = #tpu.dot_dimension_numbers<[1], [0], [0], [1], [0, 0, 1, 1], [], []>} : vector<16x16xf32>, vector<16x32xf32>, vector<16x32xf32> -> vector<16x32xf32>
    %81 = arith.addf %61, %80 : vector<16x32xf32>
    %82 = arith.addf %24, %81 : vector<16x32xf32>
    %cst_38 = arith.constant dense<0.000000e+00> : vector<16xf32>
    %83 = vector.multi_reduction <add>, %82, %cst_38 [1] : vector<16x32xf32> to vector<16xf32>
    %84 = vector.shape_cast %83 : vector<16xf32> to vector<16x1xf32>
    %cst_39 = arith.constant 3.200000e+01 : f32
    %85 = vector.broadcast %cst_39 : f32 to vector<16x1xf32>
    %86 = arith.divf %84, %85 : vector<16x1xf32>
    %87 = vector.broadcast %86 : vector<16x1xf32> to vector<16x32xf32>
    %88 = arith.subf %82, %87 : vector<16x32xf32>
    %89 = arith.mulf %88, %88 : vector<16x32xf32>
    %cst_40 = arith.constant dense<0.000000e+00> : vector<16xf32>
    %90 = vector.multi_reduction <add>, %89, %cst_40 [1] : vector<16x32xf32> to vector<16xf32>
    %91 = vector.shape_cast %90 : vector<16xf32> to vector<16x1xf32>
    %cst_41 = arith.constant 3.200000e+01 : f32
    %92 = vector.broadcast %cst_41 : f32 to vector<16x1xf32>
    %93 = arith.divf %91, %92 : vector<16x1xf32>
    %94 = vector.broadcast %86 : vector<16x1xf32> to vector<16x32xf32>
    %95 = arith.subf %82, %94 : vector<16x32xf32>
    %cst_42 = arith.constant 9.99999996E-13 : f32
    %96 = vector.broadcast %cst_42 : f32 to vector<16x1xf32>
    %97 = arith.addf %93, %96 : vector<16x1xf32>
    %98 = math.rsqrt %97 : vector<16x1xf32>
    %99 = vector.broadcast %98 : vector<16x1xf32> to vector<16x32xf32>
    %100 = arith.mulf %95, %99 : vector<16x32xf32>
    %101 = vector.broadcast %29 : vector<1x32xf32> to vector<16x32xf32>
    %102 = arith.mulf %100, %101 : vector<16x32xf32>
    %103 = vector.broadcast %30 : vector<1x32xf32> to vector<16x32xf32>
    %104 = arith.addf %102, %103 : vector<16x32xf32>
    %c0_43 = arith.constant 0 : index
    %c0_44 = arith.constant 0 : index
    %c0_45 = arith.constant 0 : index
    %105 = vector.load %arg8[%c0_43, %c0_44, %c0_45] : memref<2x32x64xf32, #tpu.memory_space<vmem>>, vector<1x32x64xf32>
    %106 = vector.shape_cast %105 : vector<1x32x64xf32> to vector<32x64xf32>
    %cst_46 = arith.constant dense<0.000000e+00> : vector<16x64xf32>
    %107 = tpu.matmul %104, %106, %cst_46 {dimension_numbers = #tpu.dot_dimension_numbers<[1], [0], [0], [1], [0, 0, 1, 1], [], []>} : vector<16x32xf32>, vector<32x64xf32>, vector<16x64xf32> -> vector<16x64xf32>
    %c0_47 = arith.constant 0 : index
    %c0_48 = arith.constant 0 : index
    %c0_49 = arith.constant 0 : index
    %108 = vector.load %arg9[%c0_47, %c0_48, %c0_49] : memref<2x1x64xf32, #tpu.memory_space<vmem>>, vector<1x1x64xf32>
    %109 = vector.shape_cast %108 : vector<1x1x64xf32> to vector<1x64xf32>
    %110 = vector.broadcast %109 : vector<1x64xf32> to vector<16x64xf32>
    %111 = arith.addf %107, %110 : vector<16x64xf32>
    %112 = arith.mulf %111, %111 : vector<16x64xf32>
    %113 = arith.mulf %111, %112 : vector<16x64xf32>
    %cst_50 = arith.constant 4.471500e-02 : f32
    %114 = vector.broadcast %cst_50 : f32 to vector<16x64xf32>
    %115 = arith.mulf %114, %113 : vector<16x64xf32>
    %116 = arith.addf %111, %115 : vector<16x64xf32>
    %cst_51 = arith.constant 0.797884583 : f32
    %117 = vector.broadcast %cst_51 : f32 to vector<16x64xf32>
    %118 = arith.mulf %117, %116 : vector<16x64xf32>
    %119 = math.tanh %118 : vector<16x64xf32>
    %cst_52 = arith.constant 1.000000e+00 : f32
    %120 = vector.broadcast %cst_52 : f32 to vector<16x64xf32>
    %121 = arith.addf %120, %119 : vector<16x64xf32>
    %cst_53 = arith.constant 5.000000e-01 : f32
    %122 = vector.broadcast %cst_53 : f32 to vector<16x64xf32>
    %123 = arith.mulf %122, %121 : vector<16x64xf32>
    %124 = arith.mulf %111, %123 : vector<16x64xf32>
    %c0_54 = arith.constant 0 : index
    %c0_55 = arith.constant 0 : index
    %c0_56 = arith.constant 0 : index
    %125 = vector.load %arg10[%c0_54, %c0_55, %c0_56] : memref<2x64x32xf32, #tpu.memory_space<vmem>>, vector<1x64x32xf32>
    %126 = vector.shape_cast %125 : vector<1x64x32xf32> to vector<64x32xf32>
    %cst_57 = arith.constant dense<0.000000e+00> : vector<16x32xf32>
    %127 = tpu.matmul %124, %126, %cst_57 {dimension_numbers = #tpu.dot_dimension_numbers<[1], [0], [0], [1], [0, 0, 1, 1], [], []>} : vector<16x64xf32>, vector<64x32xf32>, vector<16x32xf32> -> vector<16x32xf32>
    %128 = vector.broadcast %31 : vector<1x32xf32> to vector<16x32xf32>
    %129 = arith.addf %127, %128 : vector<16x32xf32>
    %130 = arith.addf %104, %129 : vector<16x32xf32>
    %cst_58 = arith.constant dense<0.000000e+00> : vector<16xf32>
    %131 = vector.multi_reduction <add>, %130, %cst_58 [1] : vector<16x32xf32> to vector<16xf32>
    %132 = vector.shape_cast %131 : vector<16xf32> to vector<16x1xf32>
    %cst_59 = arith.constant 3.200000e+01 : f32
    %133 = vector.broadcast %cst_59 : f32 to vector<16x1xf32>
    %134 = arith.divf %132, %133 : vector<16x1xf32>
    %135 = vector.broadcast %134 : vector<16x1xf32> to vector<16x32xf32>
    %136 = arith.subf %130, %135 : vector<16x32xf32>
    %137 = arith.mulf %136, %136 : vector<16x32xf32>
    %cst_60 = arith.constant dense<0.000000e+00> : vector<16xf32>
    %138 = vector.multi_reduction <add>, %137, %cst_60 [1] : vector<16x32xf32> to vector<16xf32>
    %139 = vector.shape_cast %138 : vector<16xf32> to vector<16x1xf32>
    %cst_61 = arith.constant 3.200000e+01 : f32
    %140 = vector.broadcast %cst_61 : f32 to vector<16x1xf32>
    %141 = arith.divf %139, %140 : vector<16x1xf32>
    %142 = vector.broadcast %134 : vector<16x1xf32> to vector<16x32xf32>
    %143 = arith.subf %130, %142 : vector<16x32xf32>
    %cst_62 = arith.constant 9.99999996E-13 : f32
    %144 = vector.broadcast %cst_62 : f32 to vector<16x1xf32>
    %145 = arith.addf %141, %144 : vector<16x1xf32>
    %146 = math.rsqrt %145 : vector<16x1xf32>
    %147 = vector.broadcast %146 : vector<16x1xf32> to vector<16x32xf32>
    %148 = arith.mulf %143, %147 : vector<16x32xf32>
    %149 = vector.broadcast %32 : vector<1x32xf32> to vector<16x32xf32>
    %150 = arith.mulf %148, %149 : vector<16x32xf32>
    %151 = vector.broadcast %33 : vector<1x32xf32> to vector<16x32xf32>
    %152 = arith.addf %150, %151 : vector<16x32xf32>
    %c1_63 = arith.constant 1 : index
    %c0_64 = arith.constant 0 : index
    %c0_65 = arith.constant 0 : index
    %153 = vector.load %arg7[%c1_63, %c0_64, %c0_65] : memref<2x6x32xf32, #tpu.memory_space<vmem>>, vector<1x6x32xf32>
    %154 = vector.shape_cast %153 : vector<1x6x32xf32> to vector<6x32xf32>
    %155 = vector.extract_strided_slice %154 {offsets = [0, 0], sizes = [1, 32], strides = [1, 1]} : vector<6x32xf32> to vector<1x32xf32>
    %156 = vector.extract_strided_slice %154 {offsets = [1, 0], sizes = [1, 32], strides = [1, 1]} : vector<6x32xf32> to vector<1x32xf32>
    %157 = vector.extract_strided_slice %154 {offsets = [2, 0], sizes = [1, 32], strides = [1, 1]} : vector<6x32xf32> to vector<1x32xf32>
    %158 = vector.extract_strided_slice %154 {offsets = [3, 0], sizes = [1, 32], strides = [1, 1]} : vector<6x32xf32> to vector<1x32xf32>
    %159 = vector.extract_strided_slice %154 {offsets = [4, 0], sizes = [1, 32], strides = [1, 1]} : vector<6x32xf32> to vector<1x32xf32>
    %160 = vector.extract_strided_slice %154 {offsets = [5, 0], sizes = [1, 32], strides = [1, 1]} : vector<6x32xf32> to vector<1x32xf32>
    %c1_66 = arith.constant 1 : index
    %c0_67 = arith.constant 0 : index
    %c0_68 = arith.constant 0 : index
    %161 = vector.load %arg4[%c1_66, %c0_67, %c0_68] : memref<2x32x96xf32, #tpu.memory_space<vmem>>, vector<1x32x96xf32>
    %162 = vector.shape_cast %161 : vector<1x32x96xf32> to vector<32x96xf32>
    %cst_69 = arith.constant dense<0.000000e+00> : vector<16x96xf32>
    %163 = tpu.matmul %152, %162, %cst_69 {dimension_numbers = #tpu.dot_dimension_numbers<[1], [0], [0], [1], [0, 0, 1, 1], [], []>} : vector<16x32xf32>, vector<32x96xf32>, vector<16x96xf32> -> vector<16x96xf32>
    %c1_70 = arith.constant 1 : index
    %c0_71 = arith.constant 0 : index
    %c0_72 = arith.constant 0 : index
    %164 = vector.load %arg5[%c1_70, %c0_71, %c0_72] : memref<2x1x96xf32, #tpu.memory_space<vmem>>, vector<1x1x96xf32>
    %165 = vector.shape_cast %164 : vector<1x1x96xf32> to vector<1x96xf32>
    %166 = vector.broadcast %165 : vector<1x96xf32> to vector<16x96xf32>
    %167 = arith.addf %163, %166 : vector<16x96xf32>
    %168 = vector.extract_strided_slice %167 {offsets = [0, 0], sizes = [16, 16], strides = [1, 1]} : vector<16x96xf32> to vector<16x16xf32>
    %169 = vector.extract_strided_slice %167 {offsets = [0, 32], sizes = [16, 16], strides = [1, 1]} : vector<16x96xf32> to vector<16x16xf32>
    %170 = vector.extract_strided_slice %167 {offsets = [0, 64], sizes = [16, 16], strides = [1, 1]} : vector<16x96xf32> to vector<16x16xf32>
    "tpu.trace_start"() <{level = 10 : i32, message = "qd,kd->qk"}> : () -> ()
    %cst_73 = arith.constant dense<0.000000e+00> : vector<16x16xf32>
    %171 = tpu.matmul %168, %169, %cst_73 {dimension_numbers = #tpu.dot_dimension_numbers<[1], [1], [0], [0], [0, 0, 1, 0], [], []>} : vector<16x16xf32>, vector<16x16xf32>, vector<16x16xf32> -> vector<16x16xf32>
    "tpu.trace_stop"() : () -> ()
    %172 = arith.addf %171, %25 : vector<16x16xf32>
    %cst_74 = arith.constant dense<0xFF800000> : vector<16xf32>
    %173 = vector.multi_reduction <maximumf>, %172, %cst_74 [1] : vector<16x16xf32> to vector<16xf32>
    %174 = vector.shape_cast %173 : vector<16xf32> to vector<16x1xf32>
    %175 = vector.broadcast %174 : vector<16x1xf32> to vector<16x16xf32>
    %176 = arith.subf %172, %175 : vector<16x16xf32>
    %177 = math.exp %176 : vector<16x16xf32>
    %cst_75 = arith.constant dense<0.000000e+00> : vector<16xf32>
    %178 = vector.multi_reduction <add>, %177, %cst_75 [1] : vector<16x16xf32> to vector<16xf32>
    %179 = vector.shape_cast %178 : vector<16xf32> to vector<16x1xf32>
    %180 = tpu.reciprocal %179 {approx = true} : vector<16x1xf32> -> vector<16x1xf32>
    %181 = vector.broadcast %180 : vector<16x1xf32> to vector<16x16xf32>
    %182 = arith.mulf %177, %181 : vector<16x16xf32>
    %cst_76 = arith.constant dense<0.000000e+00> : vector<16x16xf32>
    %183 = tpu.matmul %182, %170, %cst_76 {dimension_numbers = #tpu.dot_dimension_numbers<[1], [0], [0], [1], [0, 0, 1, 1], [], []>} : vector<16x16xf32>, vector<16x16xf32>, vector<16x16xf32> -> vector<16x16xf32>
    %c1_77 = arith.constant 1 : index
    %c0_78 = arith.constant 0 : index
    %c0_79 = arith.constant 0 : index
    %c0_80 = arith.constant 0 : index
    %184 = vector.load %arg6[%c1_77, %c0_78, %c0_79, %c0_80] : memref<2x2x16x32xf32, #tpu.memory_space<vmem>>, vector<1x1x16x32xf32>
    %185 = vector.shape_cast %184 : vector<1x1x16x32xf32> to vector<16x32xf32>
    %cst_81 = arith.constant dense<0.000000e+00> : vector<16x32xf32>
    %186 = tpu.matmul %183, %185, %cst_81 {dimension_numbers = #tpu.dot_dimension_numbers<[1], [0], [0], [1], [0, 0, 1, 1], [], []>} : vector<16x16xf32>, vector<16x32xf32>, vector<16x32xf32> -> vector<16x32xf32>
    %187 = vector.broadcast %155 : vector<1x32xf32> to vector<16x32xf32>
    %188 = arith.addf %187, %186 : vector<16x32xf32>
    %189 = vector.extract_strided_slice %167 {offsets = [0, 16], sizes = [16, 16], strides = [1, 1]} : vector<16x96xf32> to vector<16x16xf32>
    %190 = vector.extract_strided_slice %167 {offsets = [0, 48], sizes = [16, 16], strides = [1, 1]} : vector<16x96xf32> to vector<16x16xf32>
    %191 = vector.extract_strided_slice %167 {offsets = [0, 80], sizes = [16, 16], strides = [1, 1]} : vector<16x96xf32> to vector<16x16xf32>
    "tpu.trace_start"() <{level = 10 : i32, message = "qd,kd->qk"}> : () -> ()
    %cst_82 = arith.constant dense<0.000000e+00> : vector<16x16xf32>
    %192 = tpu.matmul %189, %190, %cst_82 {dimension_numbers = #tpu.dot_dimension_numbers<[1], [1], [0], [0], [0, 0, 1, 0], [], []>} : vector<16x16xf32>, vector<16x16xf32>, vector<16x16xf32> -> vector<16x16xf32>
    "tpu.trace_stop"() : () -> ()
    %193 = arith.addf %192, %25 : vector<16x16xf32>
    %cst_83 = arith.constant dense<0xFF800000> : vector<16xf32>
    %194 = vector.multi_reduction <maximumf>, %193, %cst_83 [1] : vector<16x16xf32> to vector<16xf32>
    %195 = vector.shape_cast %194 : vector<16xf32> to vector<16x1xf32>
    %196 = vector.broadcast %195 : vector<16x1xf32> to vector<16x16xf32>
    %197 = arith.subf %193, %196 : vector<16x16xf32>
    %198 = math.exp %197 : vector<16x16xf32>
    %cst_84 = arith.constant dense<0.000000e+00> : vector<16xf32>
    %199 = vector.multi_reduction <add>, %198, %cst_84 [1] : vector<16x16xf32> to vector<16xf32>
    %200 = vector.shape_cast %199 : vector<16xf32> to vector<16x1xf32>
    %201 = tpu.reciprocal %200 {approx = true} : vector<16x1xf32> -> vector<16x1xf32>
    %202 = vector.broadcast %201 : vector<16x1xf32> to vector<16x16xf32>
    %203 = arith.mulf %198, %202 : vector<16x16xf32>
    %cst_85 = arith.constant dense<0.000000e+00> : vector<16x16xf32>
    %204 = tpu.matmul %203, %191, %cst_85 {dimension_numbers = #tpu.dot_dimension_numbers<[1], [0], [0], [1], [0, 0, 1, 1], [], []>} : vector<16x16xf32>, vector<16x16xf32>, vector<16x16xf32> -> vector<16x16xf32>
    %c1_86 = arith.constant 1 : index
    %c1_87 = arith.constant 1 : index
    %c0_88 = arith.constant 0 : index
    %c0_89 = arith.constant 0 : index
    %205 = vector.load %arg6[%c1_86, %c1_87, %c0_88, %c0_89] : memref<2x2x16x32xf32, #tpu.memory_space<vmem>>, vector<1x1x16x32xf32>
    %206 = vector.shape_cast %205 : vector<1x1x16x32xf32> to vector<16x32xf32>
    %cst_90 = arith.constant dense<0.000000e+00> : vector<16x32xf32>
    %207 = tpu.matmul %204, %206, %cst_90 {dimension_numbers = #tpu.dot_dimension_numbers<[1], [0], [0], [1], [0, 0, 1, 1], [], []>} : vector<16x16xf32>, vector<16x32xf32>, vector<16x32xf32> -> vector<16x32xf32>
    %208 = arith.addf %188, %207 : vector<16x32xf32>
    %209 = arith.addf %152, %208 : vector<16x32xf32>
    %cst_91 = arith.constant dense<0.000000e+00> : vector<16xf32>
    %210 = vector.multi_reduction <add>, %209, %cst_91 [1] : vector<16x32xf32> to vector<16xf32>
    %211 = vector.shape_cast %210 : vector<16xf32> to vector<16x1xf32>
    %cst_92 = arith.constant 3.200000e+01 : f32
    %212 = vector.broadcast %cst_92 : f32 to vector<16x1xf32>
    %213 = arith.divf %211, %212 : vector<16x1xf32>
    %214 = vector.broadcast %213 : vector<16x1xf32> to vector<16x32xf32>
    %215 = arith.subf %209, %214 : vector<16x32xf32>
    %216 = arith.mulf %215, %215 : vector<16x32xf32>
    %cst_93 = arith.constant dense<0.000000e+00> : vector<16xf32>
    %217 = vector.multi_reduction <add>, %216, %cst_93 [1] : vector<16x32xf32> to vector<16xf32>
    %218 = vector.shape_cast %217 : vector<16xf32> to vector<16x1xf32>
    %cst_94 = arith.constant 3.200000e+01 : f32
    %219 = vector.broadcast %cst_94 : f32 to vector<16x1xf32>
    %220 = arith.divf %218, %219 : vector<16x1xf32>
    %221 = vector.broadcast %213 : vector<16x1xf32> to vector<16x32xf32>
    %222 = arith.subf %209, %221 : vector<16x32xf32>
    %cst_95 = arith.constant 9.99999996E-13 : f32
    %223 = vector.broadcast %cst_95 : f32 to vector<16x1xf32>
    %224 = arith.addf %220, %223 : vector<16x1xf32>
    %225 = math.rsqrt %224 : vector<16x1xf32>
    %226 = vector.broadcast %225 : vector<16x1xf32> to vector<16x32xf32>
    %227 = arith.mulf %222, %226 : vector<16x32xf32>
    %228 = vector.broadcast %156 : vector<1x32xf32> to vector<16x32xf32>
    %229 = arith.mulf %227, %228 : vector<16x32xf32>
    %230 = vector.broadcast %157 : vector<1x32xf32> to vector<16x32xf32>
    %231 = arith.addf %229, %230 : vector<16x32xf32>
    %c1_96 = arith.constant 1 : index
    %c0_97 = arith.constant 0 : index
    %c0_98 = arith.constant 0 : index
    %232 = vector.load %arg8[%c1_96, %c0_97, %c0_98] : memref<2x32x64xf32, #tpu.memory_space<vmem>>, vector<1x32x64xf32>
    %233 = vector.shape_cast %232 : vector<1x32x64xf32> to vector<32x64xf32>
    %cst_99 = arith.constant dense<0.000000e+00> : vector<16x64xf32>
    %234 = tpu.matmul %231, %233, %cst_99 {dimension_numbers = #tpu.dot_dimension_numbers<[1], [0], [0], [1], [0, 0, 1, 1], [], []>} : vector<16x32xf32>, vector<32x64xf32>, vector<16x64xf32> -> vector<16x64xf32>
    %c1_100 = arith.constant 1 : index
    %c0_101 = arith.constant 0 : index
    %c0_102 = arith.constant 0 : index
    %235 = vector.load %arg9[%c1_100, %c0_101, %c0_102] : memref<2x1x64xf32, #tpu.memory_space<vmem>>, vector<1x1x64xf32>
    %236 = vector.shape_cast %235 : vector<1x1x64xf32> to vector<1x64xf32>
    %237 = vector.broadcast %236 : vector<1x64xf32> to vector<16x64xf32>
    %238 = arith.addf %234, %237 : vector<16x64xf32>
    %239 = arith.mulf %238, %238 : vector<16x64xf32>
    %240 = arith.mulf %238, %239 : vector<16x64xf32>
    %cst_103 = arith.constant 4.471500e-02 : f32
    %241 = vector.broadcast %cst_103 : f32 to vector<16x64xf32>
    %242 = arith.mulf %241, %240 : vector<16x64xf32>
    %243 = arith.addf %238, %242 : vector<16x64xf32>
    %cst_104 = arith.constant 0.797884583 : f32
    %244 = vector.broadcast %cst_104 : f32 to vector<16x64xf32>
    %245 = arith.mulf %244, %243 : vector<16x64xf32>
    %246 = math.tanh %245 : vector<16x64xf32>
    %cst_105 = arith.constant 1.000000e+00 : f32
    %247 = vector.broadcast %cst_105 : f32 to vector<16x64xf32>
    %248 = arith.addf %247, %246 : vector<16x64xf32>
    %cst_106 = arith.constant 5.000000e-01 : f32
    %249 = vector.broadcast %cst_106 : f32 to vector<16x64xf32>
    %250 = arith.mulf %249, %248 : vector<16x64xf32>
    %251 = arith.mulf %238, %250 : vector<16x64xf32>
    %c1_107 = arith.constant 1 : index
    %c0_108 = arith.constant 0 : index
    %c0_109 = arith.constant 0 : index
    %252 = vector.load %arg10[%c1_107, %c0_108, %c0_109] : memref<2x64x32xf32, #tpu.memory_space<vmem>>, vector<1x64x32xf32>
    %253 = vector.shape_cast %252 : vector<1x64x32xf32> to vector<64x32xf32>
    %cst_110 = arith.constant dense<0.000000e+00> : vector<16x32xf32>
    %254 = tpu.matmul %251, %253, %cst_110 {dimension_numbers = #tpu.dot_dimension_numbers<[1], [0], [0], [1], [0, 0, 1, 1], [], []>} : vector<16x64xf32>, vector<64x32xf32>, vector<16x32xf32> -> vector<16x32xf32>
    %255 = vector.broadcast %158 : vector<1x32xf32> to vector<16x32xf32>
    %256 = arith.addf %254, %255 : vector<16x32xf32>
    %257 = arith.addf %231, %256 : vector<16x32xf32>
    %cst_111 = arith.constant dense<0.000000e+00> : vector<16xf32>
    %258 = vector.multi_reduction <add>, %257, %cst_111 [1] : vector<16x32xf32> to vector<16xf32>
    %259 = vector.shape_cast %258 : vector<16xf32> to vector<16x1xf32>
    %cst_112 = arith.constant 3.200000e+01 : f32
    %260 = vector.broadcast %cst_112 : f32 to vector<16x1xf32>
    %261 = arith.divf %259, %260 : vector<16x1xf32>
    %262 = vector.broadcast %261 : vector<16x1xf32> to vector<16x32xf32>
    %263 = arith.subf %257, %262 : vector<16x32xf32>
    %264 = arith.mulf %263, %263 : vector<16x32xf32>
    %cst_113 = arith.constant dense<0.000000e+00> : vector<16xf32>
    %265 = vector.multi_reduction <add>, %264, %cst_113 [1] : vector<16x32xf32> to vector<16xf32>
    %266 = vector.shape_cast %265 : vector<16xf32> to vector<16x1xf32>
    %cst_114 = arith.constant 3.200000e+01 : f32
    %267 = vector.broadcast %cst_114 : f32 to vector<16x1xf32>
    %268 = arith.divf %266, %267 : vector<16x1xf32>
    %269 = vector.broadcast %261 : vector<16x1xf32> to vector<16x32xf32>
    %270 = arith.subf %257, %269 : vector<16x32xf32>
    %cst_115 = arith.constant 9.99999996E-13 : f32
    %271 = vector.broadcast %cst_115 : f32 to vector<16x1xf32>
    %272 = arith.addf %268, %271 : vector<16x1xf32>
    %273 = math.rsqrt %272 : vector<16x1xf32>
    %274 = vector.broadcast %273 : vector<16x1xf32> to vector<16x32xf32>
    %275 = arith.mulf %270, %274 : vector<16x32xf32>
    %276 = vector.broadcast %159 : vector<1x32xf32> to vector<16x32xf32>
    %277 = arith.mulf %275, %276 : vector<16x32xf32>
    %278 = vector.broadcast %160 : vector<1x32xf32> to vector<16x32xf32>
    %279 = arith.addf %277, %278 : vector<16x32xf32>
    %c0_116 = arith.constant 0 : index
    %c0_117 = arith.constant 0 : index
    %280 = vector.load %arg14[%c0_116, %c0_117] : memref<16x32xf32, #tpu.memory_space<vmem>>, vector<16x32xf32>
    tpu.vector_store %arg14[%c0_116, %c0_117], %279 {strides = array<i32>} : memref<16x32xf32, #tpu.memory_space<vmem>>, vector<16x32xf32>,
    %c0_118 = arith.constant 0 : index
    %c0_119 = arith.constant 0 : index
    %281 = vector.load %arg12[%c0_118, %c0_119] : memref<1x32xf32, #tpu.memory_space<vmem>>, vector<1x32xf32>
    %c0_120 = arith.constant 0 : index
    %282 = memref.load %arg0[%c0_120] : memref<2xi32, #tpu.memory_space<smem>>
    %c0_i32 = arith.constant 0 : i32
    %283 = arith.addi %c0_i32, %282 : i32
    %c1_i32 = arith.constant 1 : i32
    %284 = arith.subi %283, %c1_i32 : i32
    %c0_i32_121 = arith.constant 0 : i32
    %285 = arith.addi %284, %c0_i32_121 : i32
    %286 = arith.index_cast %285 : i32 to index
    %c0_122 = arith.constant 0 : index
    %287 = vector.load %arg14[%286, %c0_122] : memref<16x32xf32, #tpu.memory_space<vmem>>, vector<1x32xf32>
    %c0_123 = arith.constant 0 : index
    %c0_124 = arith.constant 0 : index
    %c0_125 = arith.constant 0 : index
    %288 = vector.load %arg11[%c0_123, %c0_124, %c0_125] : memref<3x32x32xf32, #tpu.memory_space<vmem>>, vector<1x32x32xf32>
    %289 = vector.shape_cast %288 : vector<1x32x32xf32> to vector<32x32xf32>
    %cst_126 = arith.constant dense<0.000000e+00> : vector<1x32xf32>
    %290 = tpu.matmul %287, %289, %cst_126 {dimension_numbers = #tpu.dot_dimension_numbers<[1], [0], [0], [1], [0, 0, 1, 1], [], []>} : vector<1x32xf32>, vector<32x32xf32>, vector<1x32xf32> -> vector<1x32xf32>
    %291 = arith.addf %281, %290 : vector<1x32xf32>
    %c1_i32_127 = arith.constant 1 : i32
    %292 = arith.addi %284, %c1_i32_127 : i32
    %293 = arith.index_cast %292 : i32 to index
    %c0_128 = arith.constant 0 : index
    %294 = vector.load %arg14[%293, %c0_128] : memref<16x32xf32, #tpu.memory_space<vmem>>, vector<1x32xf32>
    %c1_129 = arith.constant 1 : index
    %c0_130 = arith.constant 0 : index
    %c0_131 = arith.constant 0 : index
    %295 = vector.load %arg11[%c1_129, %c0_130, %c0_131] : memref<3x32x32xf32, #tpu.memory_space<vmem>>, vector<1x32x32xf32>
    %296 = vector.shape_cast %295 : vector<1x32x32xf32> to vector<32x32xf32>
    %cst_132 = arith.constant dense<0.000000e+00> : vector<1x32xf32>
    %297 = tpu.matmul %294, %296, %cst_132 {dimension_numbers = #tpu.dot_dimension_numbers<[1], [0], [0], [1], [0, 0, 1, 1], [], []>} : vector<1x32xf32>, vector<32x32xf32>, vector<1x32xf32> -> vector<1x32xf32>
    %298 = arith.addf %291, %297 : vector<1x32xf32>
    %c2_i32 = arith.constant 2 : i32
    %299 = arith.addi %284, %c2_i32 : i32
    %300 = arith.index_cast %299 : i32 to index
    %c0_133 = arith.constant 0 : index
    %301 = vector.load %arg14[%300, %c0_133] : memref<16x32xf32, #tpu.memory_space<vmem>>, vector<1x32xf32>
    %c2 = arith.constant 2 : index
    %c0_134 = arith.constant 0 : index
    %c0_135 = arith.constant 0 : index
    %302 = vector.load %arg11[%c2, %c0_134, %c0_135] : memref<3x32x32xf32, #tpu.memory_space<vmem>>, vector<1x32x32xf32>
    %303 = vector.shape_cast %302 : vector<1x32x32xf32> to vector<32x32xf32>
    %cst_136 = arith.constant dense<0.000000e+00> : vector<1x32xf32>
    %304 = tpu.matmul %301, %303, %cst_136 {dimension_numbers = #tpu.dot_dimension_numbers<[1], [0], [0], [1], [0, 0, 1, 1], [], []>} : vector<1x32xf32>, vector<32x32xf32>, vector<1x32xf32> -> vector<1x32xf32>
    %305 = arith.addf %298, %304 : vector<1x32xf32>
    %c0_137 = arith.constant 0 : index
    %c0_138 = arith.constant 0 : index
    %306 = vector.load %arg13[%c0_137, %c0_138] : memref<2x32xf32, #tpu.memory_space<vmem>>, vector<1x32xf32>
    tpu.vector_store %arg13[%c0_137, %c0_138], %305 {strides = array<i32>} : memref<2x32xf32, #tpu.memory_space<vmem>>, vector<1x32xf32>,
    %c1_139 = arith.constant 1 : index
    %307 = memref.load %arg0[%c1_139] : memref<2xi32, #tpu.memory_space<smem>>
    %c8_i32 = arith.constant 8 : i32
    %308 = arith.addi %c8_i32, %307 : i32
    %c1_i32_140 = arith.constant 1 : i32
    %309 = arith.subi %308, %c1_i32_140 : i32
    %c0_i32_141 = arith.constant 0 : i32
    %310 = arith.addi %309, %c0_i32_141 : i32
    %311 = arith.index_cast %310 : i32 to index
    %c0_142 = arith.constant 0 : index
    %312 = vector.load %arg14[%311, %c0_142] : memref<16x32xf32, #tpu.memory_space<vmem>>, vector<1x32xf32>
    %c0_143 = arith.constant 0 : index
    %c0_144 = arith.constant 0 : index
    %c0_145 = arith.constant 0 : index
    %313 = vector.load %arg11[%c0_143, %c0_144, %c0_145] : memref<3x32x32xf32, #tpu.memory_space<vmem>>, vector<1x32x32xf32>
    %314 = vector.shape_cast %313 : vector<1x32x32xf32> to vector<32x32xf32>
    %cst_146 = arith.constant dense<0.000000e+00> : vector<1x32xf32>
    %315 = tpu.matmul %312, %314, %cst_146 {dimension_numbers = #tpu.dot_dimension_numbers<[1], [0], [0], [1], [0, 0, 1, 1], [], []>} : vector<1x32xf32>, vector<32x32xf32>, vector<1x32xf32> -> vector<1x32xf32>
    %316 = arith.addf %281, %315 : vector<1x32xf32>
    %c1_i32_147 = arith.constant 1 : i32
    %317 = arith.addi %309, %c1_i32_147 : i32
    %318 = arith.index_cast %317 : i32 to index
    %c0_148 = arith.constant 0 : index
    %319 = vector.load %arg14[%318, %c0_148] : memref<16x32xf32, #tpu.memory_space<vmem>>, vector<1x32xf32>
    %c1_149 = arith.constant 1 : index
    %c0_150 = arith.constant 0 : index
    %c0_151 = arith.constant 0 : index
    %320 = vector.load %arg11[%c1_149, %c0_150, %c0_151] : memref<3x32x32xf32, #tpu.memory_space<vmem>>, vector<1x32x32xf32>
    %321 = vector.shape_cast %320 : vector<1x32x32xf32> to vector<32x32xf32>
    %cst_152 = arith.constant dense<0.000000e+00> : vector<1x32xf32>
    %322 = tpu.matmul %319, %321, %cst_152 {dimension_numbers = #tpu.dot_dimension_numbers<[1], [0], [0], [1], [0, 0, 1, 1], [], []>} : vector<1x32xf32>, vector<32x32xf32>, vector<1x32xf32> -> vector<1x32xf32>
    %323 = arith.addf %316, %322 : vector<1x32xf32>
    %c2_i32_153 = arith.constant 2 : i32
    %324 = arith.addi %309, %c2_i32_153 : i32
    %325 = arith.index_cast %324 : i32 to index
    %c0_154 = arith.constant 0 : index
    %326 = vector.load %arg14[%325, %c0_154] : memref<16x32xf32, #tpu.memory_space<vmem>>, vector<1x32xf32>
    %c2_155 = arith.constant 2 : index
    %c0_156 = arith.constant 0 : index
    %c0_157 = arith.constant 0 : index
    %327 = vector.load %arg11[%c2_155, %c0_156, %c0_157] : memref<3x32x32xf32, #tpu.memory_space<vmem>>, vector<1x32x32xf32>
    %328 = vector.shape_cast %327 : vector<1x32x32xf32> to vector<32x32xf32>
    %cst_158 = arith.constant dense<0.000000e+00> : vector<1x32xf32>
    %329 = tpu.matmul %326, %328, %cst_158 {dimension_numbers = #tpu.dot_dimension_numbers<[1], [0], [0], [1], [0, 0, 1, 1], [], []>} : vector<1x32xf32>, vector<32x32xf32>, vector<1x32xf32> -> vector<1x32xf32>
    %330 = arith.addf %323, %329 : vector<1x32xf32>
    %c1_159 = arith.constant 1 : index
    %c0_160 = arith.constant 0 : index
    %331 = vector.load %arg13[%c1_159, %c0_160] : memref<2x32xf32, #tpu.memory_space<vmem>>, vector<1x32xf32>
    tpu.vector_store %arg13[%c1_159, %c0_160], %330 {strides = array<i32>} : memref<2x32xf32, #tpu.memory_space<vmem>>, vector<1x32xf32>,
    return
  }
}

</mosaic_0001>

<bundles_post_ra>
// kernel: forward.1
= control target key start
LH: loop header
LB: loop body
LE: loop exit
PB: predicated region body
PF: predicated region fallthrough
CT: control target
= control target key end

     0   :  { %18 = vsyncpa [#allocation5], 0  ;;  %s2035_s0 = inlined_call_operand.vmem [shape: s32[2], index: 0, kind: input, shape index: {}]   ;;  %s2036_s1 = inlined_call_operand.vmem [shape: f32[16,32], index: 1, kind: input, shape index: {}]   ;;  %s2037_s2 = inlined_call_operand.vmem [shape: f32[16,16], index: 2, kind: input, shape index: {}]   ;;  %s2038_s3 = inlined_call_operand.vmem [shape: f32[2,32], index: 3, kind: input, shape index: {}]   ;;  %s2039_s4 = inlined_call_operand.vmem [shape: f32[2,32,96], index: 4, kind: input, shape index: {}]   ;;  %s2040_s5 = inlined_call_operand.vmem [shape: f32[2,1,96], index: 5, kind: input, shape index: {}]   ;;  %s2041_s6 = inlined_call_operand.vmem [shape: f32[2,2,16,32], index: 6, kind: input, shape index: {}]   ;;  %s2042_s7 = inlined_call_operand.vmem [shape: f32[2,6,32], index: 7, kind: input, shape index: {}]   ;;  %s2043_s8 = inlined_call_operand.vmem [shape: f32[2,32,64], index: 8, kind: input, shape index: {}]   ;;  %s2044_s9 = inlined_call_operand.vmem [shape: f32[2,1,64], index: 9, kind: input, shape index: {}]   ;;  %s2045_s10 = inlined_call_operand.vmem [shape: f32[2,64,32], index: 10, kind: input, shape index: {}]   ;;  %s2046_s11 = inlined_call_operand.vmem [shape: f32[3,32,32], index: 11, kind: input, shape index: {}]   ;;  %s2047_s12 = inlined_call_operand.vmem [shape: f32[1,32], index: 12, kind: input, shape index: {}]   ;;  %s2048_s13 = inlined_call_operand.hbm [shape: f32[2,32], index: 13, kind: output, shape index: {}]  }
   0x1   :  { %19 = vsyncpa [#allocation4], 0  ;;  %s25_s27 = sshll.u32 %s2035_s0, 4  ;;  %s1576_s28 = smov [#allocation3]   ;;  %s26_s27 = int_to_ptr.vmem [resolvable:$true] %s25_s27 }
   0x2   :  { %28 = dma.vmem_to_smem %s26_s27, 16, %s1576_s28, [#allocation5]  }
   0x3   :  { %1572 = dma.done.wait [#allocation5], 16  }
   0x4   :  { %1573 = vsyncadd [#allocation5], 4294967280 }
   0x5   :  { %57 = sfence }
   0x6   :  { %v58_v0 = vld [vmem:[%s2036_s1] sm:$0xff]  ;;  %vm62_vm0 = vcmask 261120   ;;  %v59_v2 = vld [vmem:[%s2036_s1 + $0x8] sm:$0xff]  ;;  %v1577_v4 = vmov 32.0   ;;  %v126_v21 = vld [vmem:[%s2039_s4 + $0x18] sm:$0xff]  ;;  %s1578_s27 = smov 96  }
   0x7   :  { %v63_v1 = vsel %vm62_vm0, %v58_v0, 0.0  ;;  %v66_v3 = vsel %vm62_vm0, %v59_v2, 0.0  ;;  %1474 = vrcp.f32 %v1577_v4  ;;  %149 = vmatpush.msra.mxu0 %v126_v21  ;;  %v125_v22 = vld [vmem:[%s2039_s4 + $0x10] sm:$0xff]  ;;  %v124_v23 = vld [vmem:[%s2039_s4 + $0x8] sm:$0xff]  ;;  %v123_v24 = vld [vmem:[%s2039_s4] sm:$0xff]  ;;  %vm166_vm8 = vcmask 130048  }
   0x8   :  { %64 = vadd.xlane.f32.xlu0 %v63_v1  ;;  %v1468_v39 = vld [vmem:[%s2038_s3] ss:$0 sm:$0xff]  ;;  %v1469_v43 = vld [vmem:[%s2038_s3 + $0x1] ss:$0 sm:$0xff]  ;;  %s1579_s15 = smov 64   ;;  %s1580_s0 = smov 80  }
   0x9   :  { %150 = vmatpush.msra.mxu0 %v125_v22  ;;  %v1470_v54 = vld [vmem:[%s2040_s5] ss:$0 sm:$0xff]  ;;  %s1581_s1 = smov 112   ;;  %v256_v22 = vld [vmem:[%s2041_s6 + $0x8] sm:$0xff]  ;;  %s1582_s19 = smov 48   ;;  %vm535_vm15 = vcmask 523264  }
   0xa   :  { %v1711_v60 = vld [vmem:[%s2037_s2] sm:$0xff]  ;;  %277 = vmatpush.msra.mxu3 %v256_v22  ;;  %s1422_s29 = sld [smem:[#allocation3 + $0x1]]  ;;  %s1319_s17 = sshll.u32 %s2048_s13, 4  ;;  %s1320_s17 = int_to_ptr.hbm [resolvable:$true] %s1319_s17 }
   0xb   :  { %151 = vmatpush.msra.mxu0 %v124_v23 }
   0xd   :  { %v1475_v5 = vpop.eup %1474  ;;  %152 = vmatpush.msra.mxu0 %v123_v24 }
   0xe   :  { %v70_v6 = vmul.f32 32.0, %v1475_v5  ;;  %vm74_vm1 = vweird.f32 %v1475_v5 }
  0x10   :  { %67 = vadd.xlane.f32.xlu0 %v66_v3  ;;  %v71_v7 = vsub.f32 1.0, %v70_v6  ;;  %s1333_s14 = scalar_lea.vmem [#allocation2], %s1422_s29 }
  0x12   :  { %v72_v8 = vmul.f32 %v1475_v5, %v71_v7 }
  0x14   :  { %v73_v9 = vadd.f32 %v1475_v5, %v72_v8 }
  0x16   :  { %v1665_v10 = vsel %vm74_vm1, %v1475_v5, %v73_v9 }
  0x7b   :  { %v65_v11 = vpop.xlane.xlu0 %64 }
  0x7c   :  { %v76_v12 = vmul.f32 %v1665_v10, %v65_v11 }
  0x7e   :  { %v78_v13 = vsub.f32 %v58_v0, %v76_v12  ;;  %v1718_v0 = vld [vmem:[%s2037_s2 + $0x8] sm:$0xff] }
  0x80   :  { %v80_v14 = vmul.f32 %v78_v13, %v78_v13 }
  0x82   :  { %v82_v15 = vsel %vm62_vm0, %v80_v14, 0.0 }
  0x83   :  { %83 = vadd.xlane.f32.xlu1 %v82_v15  ;;  %v68_v16 = vpop.xlane.xlu0 %67 }
  0x84   :  { %v77_v17 = vmul.f32 %v1665_v10, %v68_v16 }
  0x86   :  { %v79_v18 = vsub.f32 %v59_v2, %v77_v17 }
  0x88   :  { %v81_v19 = vmul.f32 %v79_v18, %v79_v18 }
  0x8a   :  { %v85_v20 = vsel %vm62_vm0, %v81_v19, 0.0 }
  0x8b   :  { %86 = vadd.xlane.f32.xlu1 %v85_v20 }
  0xf6   :  { %v84_v25 = vpop.xlane.xlu1 %83 }
  0xf7   :  { %v88_v26 = vmul.f32 %v84_v25, %v1665_v10 }
  0xf9   :  { %v90_v27 = vadd.f32 1e-12, %v88_v26 }
  0xfb   :  { %1476 = vrsqrt.f32 %v90_v27  ;;  %vm98_vm3 = vweird.f32 %v90_v27 }
  0xfe   :  { %v87_v28 = vpop.xlane.xlu1 %86 }
  0xff   :  { %v89_v29 = vmul.f32 %v87_v28, %v1665_v10 }
 0x101   :  { %v1477_v30 = vpop.eup %1476  ;;  %v91_v31 = vadd.f32 1e-12, %v89_v29 }
 0x102   :  { %v93_v32 = vmul.f32 %v1477_v30, %v90_v27  ;;  %vm99_vm2 = vweird.f32 %v1477_v30 }
 0x103   :  { %1478 = vrsqrt.f32 %v91_v31  ;;  %vm100_vm4 = vmor %vm98_vm3, %vm99_vm2  ;;  %vm108_vm6 = vweird.f32 %v91_v31 }
 0x104   :  { %v94_v33 = vmul.f32 %v1477_v30, %v93_v32 }
 0x106   :  { %v95_v34 = vmul.f32 0.5, %v94_v33 }
 0x108   :  { %v96_v35 = vsub.f32 1.5, %v95_v34 }
 0x109   :  { %v1479_v36 = vpop.eup %1478 }
 0x10a   :  { %v97_v37 = vmul.f32 %v1477_v30, %v96_v35  ;;  %v103_v38 = vmul.f32 %v1479_v36, %v91_v31  ;;  %vm109_vm5 = vweird.f32 %v1479_v36 }
 0x10b   :  { %vm110_vm7 = vmor %vm108_vm6, %vm109_vm5 }
 0x10c   :  { %v101_v40 = vsel %vm100_vm4, %v1477_v30, %v97_v37  ;;  %v104_v41 = vmul.f32 %v1479_v36, %v103_v38  ;;  %v255_v30 = vld [vmem:[%s2041_s6] sm:$0xff] }
 0x10d   :  { %v112_v42 = vmul.f32 %v101_v40, %v78_v13  ;;  %278 = vmatpush.msra.mxu3 %v255_v30 }
 0x10e   :  { %v105_v44 = vmul.f32 0.5, %v104_v41 }
 0x10f   :  { %v115_v45 = vmul.f32 %v1468_v39, %v112_v42 }
 0x110   :  { %v106_v46 = vsub.f32 1.5, %v105_v44 }
 0x111   :  { %v1691_v47 = vadd.f32 %v1469_v43, %v115_v45 }
 0x112   :  { %v107_v48 = vmul.f32 %v1479_v36, %v106_v46 }
 0x113   :  { %1339 = vmatmul.msk.f32.vlgmr.msra.gmra.mxu0 %vm62_vm0, %v1691_v47 }
 0x114   :  { %v111_v49 = vsel %vm110_vm7, %v1479_v36, %v107_v48 }
 0x115   :  { %v113_v50 = vmul.f32 %v111_v49, %v79_v18 }
 0x117   :  { %v116_v51 = vmul.f32 %v1468_v39, %v113_v50 }
 0x119   :  { %v1695_v52 = vadd.f32 %v1469_v43, %v116_v51 }
 0x11b   :  { %1340 = vmatmul.msk.f32.gmra.mxu0 %vm62_vm0, %v1695_v52 }
 0x190   :  { %v154_v53 = vpop.f32.mrf.mxu0 }
 0x191   :  { %v155_v57 = vadd.f32 %v1470_v54, %v154_v53 }
 0x198   :  { %v157_v55 = vpop.f32.mrf.mxu0 }
 0x199   :  { %v158_v56 = vadd.f32 %v1470_v54, %v157_v55  ;;  %v1356_v54 = vld [vmem:[%s2041_s6 + $0x18] sm:$0xff] }
 0x19a   :  { %408 = vmatpush.msrb.mxu0 %v1356_v54 }
 0x19b   :  { %164 = vrot.lane.b32.xlu2 %v158_v56, %s1578_s27  ;;  %v1448_v4 = vpack.i.bf16 %v155_v57, %v158_v56 }
 0x1a3   :  { %162 = vrot.lane.b32.xlu2 %v155_v57, %s1578_s27 }
 0x1f5   :  { %v165_v58 = vpop.permute.xlu2 %164 }
 0x1f6   :  { %1341 = vmatpush.xpose.msk.msra.mxu1 %vm166_vm8, %v165_v58 }
 0x1fd   :  { %v163_v59 = vpop.permute.xlu2 %162 }
 0x1fe   :  { %1342 = vmatpush.xpose.msk.msra.mxu1 %vm166_vm8, %v163_v59 }
 0x201   :  { %1343 = vmatmul.msk.f32.vlgmr.msra.gmra.mxu1 %vm166_vm8, %v155_v57 }
 0x209   :  { %1344 = vmatmul.msk.f32.gmra.mxu1 %vm166_vm8, %v158_v56 }
 0x27e   :  { %v192_v61 = vpop.f32.mrf.mxu1 }
 0x27f   :  { %v193_v62 = vadd.f32 %v192_v61, %v1711_v60 }
 0x281   :  { %v198_v63 = vsel %vm166_vm8, %v193_v62, -inf }
 0x282   :  { %199 = vmax.xlane.f32.xlu0 %v198_v63 }
 0x286   :  { %v195_v1 = vpop.f32.mrf.mxu1 }
 0x287   :  { %v196_v2 = vadd.f32 %v195_v1, %v1718_v0 }
 0x289   :  { %v201_v3 = vsel %vm166_vm8, %v196_v2, -inf }
 0x28a   :  { %202 = vmax.xlane.f32.xlu1 %v201_v3 }
 0x296   :  { %1449 = vrot.lane.b32.xlu0 %v1448_v4, %s1579_s15 }
 0x29e   :  { %293 = vrot.lane.b32.xlu0 %v155_v57, %s1580_s0 }
 0x2a3   :  { %295 = vrot.lane.b32.xlu1 %v158_v56, %s1580_s0 }
 0x2a6   :  { %289 = vrot.lane.b32.xlu0 %v155_v57, %s1581_s1 }
 0x2f5   :  { %v200_v5 = vpop.xlane.xlu0 %199 }
 0x2f6   :  { %v204_v6 = vsub.f32 %v193_v62, %v200_v5  ;;  %v1355_v62 = vld [vmem:[%s2041_s6 + $0x10] sm:$0xff] }
 0x2f7   :  { %409 = vmatpush.msrb.mxu0 %v1355_v62  ;;  %v531_v62 = vld [vmem:[%s2045_s10 + $0x28] sm:$0xff] }
 0x2f8   :  { %v206_v7 = vmul.f32 1.442695, %v204_v6 }
 0x2fa   :  { %1480 = vpow2.f32 %v206_v7 }
 0x2fd   :  { %v203_v8 = vpop.xlane.xlu1 %202 }
 0x2fe   :  { %v205_v9 = vsub.f32 %v196_v2, %v203_v8 }
 0x300   :  { %v1481_v11 = vpop.eup %1480  ;;  %v208_v12 = vmul.f32 1.442695, %v205_v9 }
 0x301   :  { %v210_v13 = vsel %vm166_vm8, %v1481_v11, 0.0 }
 0x302   :  { %1482 = vpow2.f32 %v208_v12  ;;  %211 = vadd.xlane.f32.xlu2 %v210_v13 }
 0x308   :  { %v1483_v14 = vpop.eup %1482  ;;  %v1450_v15 = vpop.permute.xlu0 %1449 }
 0x309   :  { %v213_v16 = vsel %vm166_vm8, %v1483_v14, 0.0  ;;  %v1451_v17 = vunpack.i.l.bf16 %v1450_v15  ;;  %v1452_v18 = vunpack.i.h.bf16 %v1450_v15 }
 0x30a   :  { %214 = vadd.xlane.f32.xlu1 %v213_v16 }
 0x30b   :  { %246 = vmatpush.msra.mxu2 %v1451_v17 }
 0x30d   :  { %247 = vmatpush.msra.mxu2 %v1452_v18 }
 0x310   :  { %v294_v20 = vpop.permute.xlu0 %293 }
 0x315   :  { %v296_v19 = vpop.permute.xlu1 %295 }
 0x316   :  { %1349 = vmatpush.xpose.msk.msrb.mxu2 %vm166_vm8, %v296_v19 }
 0x318   :  { %v290_v28 = vpop.permute.xlu0 %289 }
 0x31a   :  { %1350 = vmatpush.xpose.msk.msrb.mxu2 %vm166_vm8, %v294_v20 }
 0x323   :  { %291 = vrot.lane.b32.xlu1 %v158_v56, %s1581_s1 }
 0x375   :  { %v212_v21 = vpop.xlane.xlu2 %211 }
 0x376   :  { %1484 = vrcp.f32 %v212_v21 }
 0x37c   :  { %v1485_v23 = vpop.eup %1484 }
 0x37d   :  { %v215_v24 = vpop.xlane.xlu1 %214  ;;  %v218_v25 = vmul.f32 %v1485_v23, %v1481_v11 }
 0x37e   :  { %1486 = vrcp.f32 %v215_v24 }
 0x37f   :  { %1345 = vmatmul.msk.f32.vlgmr.msra.gmra.mxu2 %vm166_vm8, %v218_v25 }
 0x384   :  { %v1487_v26 = vpop.eup %1486 }
 0x385   :  { %v219_v27 = vmul.f32 %v1487_v26, %v1483_v14  ;;  %v473_v26 = vld [vmem:[%s2043_s8 + $0x10] sm:$0xff] }
 0x387   :  { %1346 = vmatmul.msk.f32.gmra.mxu2 %vm166_vm8, %v219_v27  ;;  %v472_v27 = vld [vmem:[%s2043_s8 + $0x8] sm:$0xff] }
 0x38f   :  { %1351 = vmatmul.msk.f32.vlgmr.msrb.gmra.mxu2 %vm166_vm8, %v290_v28  ;;  %v471_v28 = vld [vmem:[%s2043_s8] sm:$0xff] }
 0x395   :  { %v292_v29 = vpop.permute.xlu1 %291 }
 0x397   :  { %1352 = vmatmul.msk.f32.gmra.mxu2 %vm166_vm8, %v292_v29 }
 0x402   :  { %v249_v31 = vpop.f32.mrf.mxu2 }
 0x403   :  { %1347 = vmatmul.msk.f32.vlgmr.msra.gmra.mxu3 %vm166_vm8, %v249_v31 }
 0x40a   :  { %v252_v32 = vpop.f32.mrf.mxu2 }
 0x40b   :  { %1348 = vmatmul.msk.f32.gmra.mxu3 %vm166_vm8, %v252_v32 }
 0x412   :  { %v322_v33 = vpop.f32.mrf.mxu2 }
 0x413   :  { %v323_v34 = vadd.f32 %v322_v33, %v1711_v60 }
 0x415   :  { %v328_v35 = vsel %vm166_vm8, %v323_v34, -inf }
 0x416   :  { %329 = vmax.xlane.f32.xlu2 %v328_v35 }
 0x41a   :  { %v325_v36 = vpop.f32.mrf.mxu2 }
 0x41b   :  { %v326_v37 = vadd.f32 %v325_v36, %v1718_v0 }
 0x41d   :  { %v331_v38 = vsel %vm166_vm8, %v326_v37, -inf }
 0x41e   :  { %332 = vmax.xlane.f32.xlu0 %v331_v38 }
 0x42e   :  { %1454 = vrot.lane.b32.xlu2 %v1448_v4, %s1582_s19  ;;  %v1763_v4 = vld [vmem:[%s2042_s7] sm:$0x3f] }
 0x42f   :  { %v286_v5 = vperm.slane %v1763_v4, 0 }
 0x486   :  { %v280_v63 = vpop.f32.mrf.mxu3 }
 0x487   :  { %v287_v6 = vadd.f32 %v286_v5, %v280_v63  ;;  %v530_v63 = vld [vmem:[%s2045_s10 + $0x20] sm:$0xff] }
 0x489   :  { %v330_v39 = vpop.xlane.xlu2 %329 }
 0x48a   :  { %v334_v40 = vsub.f32 %v323_v34, %v330_v39 }
 0x48c   :  { %v336_v41 = vmul.f32 1.442695, %v334_v40 }
 0x48e   :  { %1488 = vpow2.f32 %v336_v41  ;;  %v283_v1 = vpop.f32.mrf.mxu3 }
 0x48f   :  { %v288_v12 = vadd.f32 %v286_v5, %v283_v1  ;;  %v529_v1 = vld [vmem:[%s2045_s10 + $0x18] sm:$0xff]  ;;  %v526_v5 = vld [vmem:[%s2045_s10] sm:$0xff] }
 0x491   :  { %v333_v42 = vpop.xlane.xlu0 %332  ;;  %v1455_v43 = vpop.permute.xlu2 %1454 }
 0x492   :  { %v335_v44 = vsub.f32 %v326_v37, %v333_v42  ;;  %v1456_v45 = vunpack.i.l.bf16 %v1455_v43  ;;  %v1457_v49 = vunpack.i.h.bf16 %v1455_v43  ;;  %v465_v43 = vperm.slane %v1763_v4, 1 }
 0x494   :  { %v1489_v46 = vpop.eup %1488  ;;  %v338_v48 = vmul.f32 1.442695, %v335_v44  ;;  %376 = vmatpush.msrb.mxu3 %v1456_v45 }
 0x495   :  { %v340_v50 = vsel %vm166_vm8, %v1489_v46, 0.0 }
 0x496   :  { %1490 = vpow2.f32 %v338_v48  ;;  %341 = vadd.xlane.f32.xlu1 %v340_v50  ;;  %377 = vmatpush.msrb.mxu3 %v1457_v49  ;;  %v468_v48 = vperm.slane %v1763_v4, 2 }
 0x49c   :  { %v1491_v51 = vpop.eup %1490 }
 0x49d   :  { %v343_v53 = vsel %vm166_vm8, %v1491_v51, 0.0 }
 0x49e   :  { %344 = vadd.xlane.f32.xlu2 %v343_v53 }
 0x509   :  { %v342_v55 = vpop.xlane.xlu1 %341 }
 0x50a   :  { %1492 = vrcp.f32 %v342_v55 }
 0x510   :  { %v1493_v56 = vpop.eup %1492 }
 0x511   :  { %v345_v57 = vpop.xlane.xlu2 %344  ;;  %v348_v58 = vmul.f32 %v1493_v56, %v1489_v46 }
 0x512   :  { %1494 = vrcp.f32 %v345_v57 }
 0x513   :  { %1353 = vmatmul.msk.f32.vlgmr.msrb.gmra.mxu3 %vm166_vm8, %v348_v58 }
 0x518   :  { %v1495_v59 = vpop.eup %1494 }
 0x519   :  { %v349_v61 = vmul.f32 %v1495_v59, %v1491_v51  ;;  %v533_v59 = vld [vmem:[%s2045_s10 + $0x38] sm:$0xff] }
 0x51a   :  { %550 = vmatpush.msra.mxu2 %v533_v59 }
 0x51b   :  { %1354 = vmatmul.msk.f32.gmra.mxu3 %vm166_vm8, %v349_v61  ;;  %v532_v61 = vld [vmem:[%s2045_s10 + $0x30] sm:$0xff] }
 0x51c   :  { %551 = vmatpush.msra.mxu2 %v532_v61 }
 0x51e   :  { %552 = vmatpush.msra.mxu2 %v531_v62 }
 0x520   :  { %553 = vmatpush.msra.mxu2 %v530_v63 }
 0x522   :  { %554 = vmatpush.msra.mxu2 %v529_v1 }
 0x596   :  { %v379_v2 = vpop.f32.mrf.mxu3 }
 0x597   :  { %1357 = vmatmul.msk.f32.vlgmr.msrb.gmra.mxu0 %vm166_vm8, %v379_v2  ;;  %v528_v2 = vld [vmem:[%s2045_s10 + $0x10] sm:$0xff] }
 0x598   :  { %555 = vmatpush.msra.mxu2 %v528_v2 }
 0x59e   :  { %v382_v3 = vpop.f32.mrf.mxu3 }
 0x59f   :  { %1358 = vmatmul.msk.f32.gmra.mxu0 %vm166_vm8, %v382_v3  ;;  %v527_v3 = vld [vmem:[%s2045_s10 + $0x8] sm:$0xff] }
 0x5a0   :  { %556 = vmatpush.msra.mxu2 %v527_v3 }
 0x5a2   :  { %557 = vmatpush.msra.mxu2 %v526_v5 }
 0x614   :  { %v411_v7 = vpop.f32.mrf.mxu0 }
 0x615   :  { %v417_v8 = vadd.f32 %v411_v7, %v287_v6  ;;  %v1471_v6 = vld [vmem:[%s2044_s9] ss:$0 sm:$0xff] }
 0x617   :  { %v419_v9 = vadd.f32 %v417_v8, %v1691_v47 }
 0x619   :  { %v421_v11 = vsel %vm62_vm0, %v419_v9, 0.0 }
 0x61a   :  { %422 = vadd.xlane.f32.xlu0 %v421_v11 }
 0x61c   :  { %v414_v13 = vpop.f32.mrf.mxu0 }
 0x61d   :  { %v418_v14 = vadd.f32 %v414_v13, %v288_v12 }
 0x61f   :  { %v420_v15 = vadd.f32 %v418_v14, %v1695_v52  ;;  %v474_v52 = vld [vmem:[%s2043_s8 + $0x18] sm:$0xff] }
 0x620   :  { %497 = vmatpush.msrb.mxu1 %v474_v52 }
 0x621   :  { %v424_v16 = vsel %vm62_vm0, %v420_v15, 0.0 }
 0x622   :  { %425 = vadd.xlane.f32.xlu1 %v424_v16  ;;  %498 = vmatpush.msrb.mxu1 %v473_v26 }
 0x624   :  { %499 = vmatpush.msrb.mxu1 %v472_v27 }
 0x626   :  { %500 = vmatpush.msrb.mxu1 %v471_v28  ;;  %v534_v28 = vperm.slane %v1763_v4, 3 }
 0x68d   :  { %v423_v17 = vpop.xlane.xlu0 %422 }
 0x68e   :  { %v427_v18 = vmul.f32 %v423_v17, %v1665_v10 }
 0x690   :  { %v429_v19 = vsub.f32 %v419_v9, %v427_v18 }
 0x692   :  { %v431_v20 = vmul.f32 %v429_v19, %v429_v19 }
 0x694   :  { %v433_v21 = vsel %vm62_vm0, %v431_v20, 0.0 }
 0x695   :  { %434 = vadd.xlane.f32.xlu0 %v433_v21  ;;  %v426_v47 = vpop.xlane.xlu1 %425 }
 0x696   :  { %v428_v22 = vmul.f32 %v426_v47, %v1665_v10 }
 0x698   :  { %v430_v23 = vsub.f32 %v420_v15, %v428_v22 }
 0x69a   :  { %v432_v24 = vmul.f32 %v430_v23, %v430_v23 }
 0x69c   :  { %v436_v25 = vsel %vm62_vm0, %v432_v24, 0.0 }
 0x69d   :  { %437 = vadd.xlane.f32.xlu1 %v436_v25 }
 0x708   :  { %v435_v29 = vpop.xlane.xlu0 %434 }
 0x709   :  { %v439_v30 = vmul.f32 %v435_v29, %v1665_v10 }
 0x70b   :  { %v441_v31 = vadd.f32 1e-12, %v439_v30 }
 0x70d   :  { %1496 = vrsqrt.f32 %v441_v31  ;;  %vm449_vm10 = vweird.f32 %v441_v31 }
 0x710   :  { %v438_v32 = vpop.xlane.xlu1 %437 }
 0x711   :  { %v440_v33 = vmul.f32 %v438_v32, %v1665_v10 }
 0x713   :  { %v1497_v34 = vpop.eup %1496  ;;  %v442_v35 = vadd.f32 1e-12, %v440_v33 }
 0x714   :  { %v444_v36 = vmul.f32 %v1497_v34, %v441_v31  ;;  %vm450_vm9 = vweird.f32 %v1497_v34 }
 0x715   :  { %1498 = vrsqrt.f32 %v442_v35  ;;  %vm451_vm11 = vmor %vm449_vm10, %vm450_vm9  ;;  %vm459_vm13 = vweird.f32 %v442_v35 }
 0x716   :  { %v445_v37 = vmul.f32 %v1497_v34, %v444_v36 }
 0x718   :  { %v446_v38 = vmul.f32 0.5, %v445_v37 }
 0x71a   :  { %v447_v39 = vsub.f32 1.5, %v446_v38 }
 0x71b   :  { %v1499_v40 = vpop.eup %1498 }
 0x71c   :  { %v448_v41 = vmul.f32 %v1497_v34, %v447_v39  ;;  %v454_v42 = vmul.f32 %v1499_v40, %v442_v35  ;;  %vm460_vm12 = vweird.f32 %v1499_v40 }
 0x71d   :  { %vm461_vm14 = vmor %vm459_vm13, %vm460_vm12 }
 0x71e   :  { %v452_v44 = vsel %vm451_vm11, %v1497_v34, %v448_v41  ;;  %v455_v45 = vmul.f32 %v1499_v40, %v454_v42 }
 0x71f   :  { %v463_v46 = vmul.f32 %v452_v44, %v429_v19 }
 0x720   :  { %v456_v49 = vmul.f32 0.5, %v455_v45 }
 0x721   :  { %v466_v50 = vmul.f32 %v465_v43, %v463_v46 }
 0x722   :  { %v457_v51 = vsub.f32 1.5, %v456_v49  ;;  %v1366_v49 = vld [vmem:[%s2039_s4 + $0x30] sm:$0xff] }
 0x723   :  { %v469_v53 = vadd.f32 %v468_v48, %v466_v50  ;;  %v1365_v50 = vld [vmem:[%s2039_s4 + $0x28] sm:$0xff] }
 0x724   :  { %v458_v54 = vmul.f32 %v1499_v40, %v457_v51  ;;  %v1364_v51 = vld [vmem:[%s2039_s4 + $0x20] sm:$0xff] }
 0x725   :  { %1359 = vmatmul.msk.f32.vlgmr.msrb.gmra.mxu1 %vm62_vm0, %v469_v53 }
 0x726   :  { %v462_v55 = vsel %vm461_vm14, %v1499_v40, %v458_v54 }
 0x727   :  { %v464_v56 = vmul.f32 %v462_v55, %v430_v23 }
 0x729   :  { %v467_v57 = vmul.f32 %v465_v43, %v464_v56 }
 0x72b   :  { %v470_v58 = vadd.f32 %v468_v48, %v467_v57  ;;  %v1367_v48 = vld [vmem:[%s2039_s4 + $0x38] sm:$0xff] }
 0x72c   :  { %647 = vmatpush.msra.mxu3 %v1367_v48 }
 0x72d   :  { %1360 = vmatmul.msk.f32.gmra.mxu1 %vm62_vm0, %v470_v58 }
 0x72e   :  { %648 = vmatpush.msra.mxu3 %v1366_v49 }
 0x730   :  { %649 = vmatpush.msra.mxu3 %v1365_v50 }
 0x732   :  { %650 = vmatpush.msra.mxu3 %v1364_v51 }
 0x7a2   :  { %v502_v7 = vpop.f32.mrf.mxu1 }
 0x7a3   :  { %v503_v8 = vadd.f32 %v1471_v6, %v502_v7 }
 0x7a5   :  { %v508_v9 = vmul.f32 %v503_v8, %v503_v8 }
 0x7a7   :  { %v510_v11 = vmul.f32 %v508_v9, %v503_v8 }
 0x7a9   :  { %v512_v12 = vmul.f32 0.044715, %v510_v11  ;;  %v614_v11 = vperm.slane %v1763_v4, 5 }
 0x7aa   :  { %v505_v13 = vpop.f32.mrf.mxu1 }
 0x7ab   :  { %v514_v14 = vadd.f32 %v512_v12, %v503_v8  ;;  %v506_v15 = vadd.f32 %v1471_v6, %v505_v13  ;;  %v611_v6 = vperm.slane %v1763_v4, 4  ;;  %v1472_v4 = vld [vmem:[%s2040_s5 + $0x1] ss:$0 sm:$0xff] }
 0x7ad   :  { %v516_v16 = vmul.f32 0.7978846, %v514_v14  ;;  %v509_v17 = vmul.f32 %v506_v15, %v506_v15 }
 0x7af   :  { %1500 = vtanh.f32 %v516_v16  ;;  %v511_v18 = vmul.f32 %v509_v17, %v506_v15 }
 0x7b1   :  { %v513_v19 = vmul.f32 0.044715, %v511_v18 }
 0x7b3   :  { %v515_v20 = vadd.f32 %v513_v19, %v506_v15 }
 0x7b5   :  { %v1501_v21 = vpop.eup %1500  ;;  %v517_v47 = vmul.f32 0.7978846, %v515_v20 }
 0x7b6   :  { %v520_v22 = vadd.f32 1.0, %v1501_v21 }
 0x7b7   :  { %1502 = vtanh.f32 %v517_v47 }
 0x7b8   :  { %v522_v23 = vmul.f32 0.5, %v520_v22 }
 0x7ba   :  { %v524_v24 = vmul.f32 %v522_v23, %v503_v8 }
 0x7bc   :  { %1361 = vmatmul.msk.f32.vlgmr.msra.gmra.mxu2 %vm535_vm15, %v524_v24 }
 0x7bd   :  { %v1503_v25 = vpop.eup %1502 }
 0x7be   :  { %v521_v52 = vadd.f32 1.0, %v1503_v25 }
 0x7c0   :  { %v523_v26 = vmul.f32 0.5, %v521_v52 }
 0x7c2   :  { %v525_v27 = vmul.f32 %v523_v26, %v506_v15 }
 0x7c4   :  { %1362 = vmatmul.msk.f32.gmra.mxu2 %vm535_vm15, %v525_v27 }
 0x83f   :  { %v559_v29 = vpop.f32.mrf.mxu2 }
 0x840   :  { %v560_v30 = vadd.f32 %v559_v29, %v534_v28 }
 0x842   :  { %v565_v31 = vadd.f32 %v560_v30, %v469_v53 }
 0x844   :  { %v567_v32 = vsel %vm62_vm0, %v565_v31, 0.0 }
 0x845   :  { %568 = vadd.xlane.f32.xlu0 %v567_v32 }
 0x847   :  { %v562_v33 = vpop.f32.mrf.mxu2 }
 0x848   :  { %v563_v34 = vadd.f32 %v562_v33, %v534_v28 }
 0x84a   :  { %v566_v35 = vadd.f32 %v563_v34, %v470_v58 }
 0x84c   :  { %v570_v36 = vsel %vm62_vm0, %v566_v35, 0.0 }
 0x84d   :  { %571 = vadd.xlane.f32.xlu1 %v570_v36 }
 0x8b8   :  { %v569_v37 = vpop.xlane.xlu0 %568 }
 0x8b9   :  { %v573_v38 = vmul.f32 %v569_v37, %v1665_v10 }
 0x8bb   :  { %v575_v39 = vsub.f32 %v565_v31, %v573_v38 }
 0x8bd   :  { %v577_v40 = vmul.f32 %v575_v39, %v575_v39 }
 0x8bf   :  { %v579_v41 = vsel %vm62_vm0, %v577_v40, 0.0 }
 0x8c0   :  { %580 = vadd.xlane.f32.xlu0 %v579_v41  ;;  %v572_v42 = vpop.xlane.xlu1 %571 }
 0x8c1   :  { %v574_v43 = vmul.f32 %v572_v42, %v1665_v10 }
 0x8c3   :  { %v576_v44 = vsub.f32 %v566_v35, %v574_v43 }
 0x8c5   :  { %v578_v45 = vmul.f32 %v576_v44, %v576_v44 }
 0x8c7   :  { %v582_v46 = vsel %vm62_vm0, %v578_v45, 0.0 }
 0x8c8   :  { %583 = vadd.xlane.f32.xlu2 %v582_v46 }
 0x933   :  { %v581_v53 = vpop.xlane.xlu0 %580 }
 0x934   :  { %v585_v54 = vmul.f32 %v581_v53, %v1665_v10 }
 0x936   :  { %v587_v55 = vadd.f32 1e-12, %v585_v54 }
 0x938   :  { %1504 = vrsqrt.f32 %v587_v55  ;;  %vm595_vm2 = vweird.f32 %v587_v55 }
 0x93b   :  { %v584_v56 = vpop.xlane.xlu2 %583 }
 0x93c   :  { %v586_v57 = vmul.f32 %v584_v56, %v1665_v10 }
 0x93e   :  { %v1505_v58 = vpop.eup %1504  ;;  %v588_v59 = vadd.f32 1e-12, %v586_v57 }
 0x93f   :  { %v590_v61 = vmul.f32 %v1505_v58, %v587_v55  ;;  %vm596_vm1 = vweird.f32 %v1505_v58 }
 0x940   :  { %1506 = vrsqrt.f32 %v588_v59  ;;  %vm597_vm3 = vmor %vm595_vm2, %vm596_vm1  ;;  %vm605_vm5 = vweird.f32 %v588_v59 }
 0x941   :  { %v591_v62 = vmul.f32 %v1505_v58, %v590_v61 }
 0x943   :  { %v592_v63 = vmul.f32 0.5, %v591_v62 }
 0x945   :  { %v593_v1 = vsub.f32 1.5, %v592_v63 }
 0x946   :  { %v1507_v2 = vpop.eup %1506 }
 0x947   :  { %v594_v3 = vmul.f32 %v1505_v58, %v593_v1  ;;  %v600_v5 = vmul.f32 %v1507_v2, %v588_v59  ;;  %vm606_vm4 = vweird.f32 %v1507_v2 }
 0x948   :  { %vm607_vm6 = vmor %vm605_vm5, %vm606_vm4  ;;  %vm1215_vm4 = vcmask 253952  }
 0x949   :  { %v598_v7 = vsel %vm597_vm3, %v1505_v58, %v594_v3  ;;  %v601_v8 = vmul.f32 %v1507_v2, %v600_v5 }
 0x94a   :  { %v609_v9 = vmul.f32 %v598_v7, %v575_v39 }
 0x94b   :  { %v602_v12 = vmul.f32 0.5, %v601_v8  ;;  %v1378_v8 = vld [vmem:[%s2041_s6 + $0x28] sm:$0xff] }
 0x94c   :  { %v612_v13 = vmul.f32 %v611_v6, %v609_v9  ;;  %775 = vmatpush.msrb.mxu2 %v1378_v8 }
 0x94d   :  { %v603_v14 = vsub.f32 1.5, %v602_v12 }
 0x94e   :  { %v1844_v15 = vadd.f32 %v614_v11, %v612_v13 }
 0x94f   :  { %v604_v16 = vmul.f32 %v1507_v2, %v603_v14 }
 0x950   :  { %1369 = vmatmul.msk.f32.vlgmr.msra.gmra.mxu3 %vm62_vm0, %v1844_v15 }
 0x951   :  { %v608_v17 = vsel %vm607_vm6, %v1507_v2, %v604_v16 }
 0x952   :  { %v610_v18 = vmul.f32 %v608_v17, %v576_v44 }
 0x954   :  { %v613_v19 = vmul.f32 %v611_v6, %v610_v18 }
 0x956   :  { %v1848_v20 = vadd.f32 %v614_v11, %v613_v19 }
 0x958   :  { %1370 = vmatmul.msk.f32.gmra.mxu3 %vm62_vm0, %v1848_v20 }
 0x9d3   :  { %v652_v21 = vpop.f32.mrf.mxu3 }
 0x9d4   :  { %v653_v47 = vadd.f32 %v1472_v4, %v652_v21 }
 0x9d6   :  { %660 = vrot.lane.b32.xlu2 %v653_v47, %s1578_s27 }
 0x9db   :  { %v655_v22 = vpop.f32.mrf.mxu3 }
 0x9dc   :  { %v656_v23 = vadd.f32 %v1472_v4, %v655_v22  ;;  %v1388_v22 = vld [vmem:[%s2041_s6 + $0x38] sm:$0xff] }
 0x9de   :  { %793 = vrot.lane.b32.xlu0 %v656_v23, %s1580_s0  ;;  %662 = vrot.lane.b32.xlu1 %v656_v23, %s1578_s27  ;;  %v1458_v41 = vpack.i.bf16 %v653_v47, %v656_v23 }
 0x9e6   :  { %791 = vrot.lane.b32.xlu0 %v653_v47, %s1580_s0  ;;  %787 = vrot.lane.b32.xlu1 %v653_v47, %s1581_s1 }
 0x9ee   :  { %789 = vrot.lane.b32.xlu0 %v656_v23, %s1581_s1 }
 0xa30   :  { %v661_v52 = vpop.permute.xlu2 %660 }
 0xa50   :  { %v794_v24 = vpop.permute.xlu0 %793  ;;  %v663_v25 = vpop.permute.xlu1 %662 }
 0xa51   :  { %1371 = vmatpush.xpose.msk.msra.mxu0 %vm166_vm8, %v663_v25  ;;  %1381 = vmatpush.xpose.msk.msrb.mxu3 %vm166_vm8, %v794_v24 }
 0xa55   :  { %1372 = vmatpush.xpose.msk.msra.mxu0 %vm166_vm8, %v661_v52 }
 0xa58   :  { %v792_v26 = vpop.permute.xlu0 %791  ;;  %1373 = vmatmul.msk.f32.vlgmr.msra.gmra.mxu0 %vm166_vm8, %v653_v47  ;;  %v788_v27 = vpop.permute.xlu1 %787  ;;  %v1377_v47 = vld [vmem:[%s2041_s6 + $0x20] sm:$0xff] }
 0xa59   :  { %1382 = vmatpush.xpose.msk.msrb.mxu3 %vm166_vm8, %v792_v26  ;;  %776 = vmatpush.msrb.mxu2 %v1377_v47  ;;  %v1405_v47 = vld [vmem:[%s2045_s10 + $0x78] sm:$0xff] }
 0xa5c   :  { %1383 = vmatmul.msk.f32.vlgmr.msrb.gmra.mxu3 %vm166_vm8, %v788_v27  ;;  %v1906_v27 = vld [vmem:[%s2042_s7 + $0x8] sm:$0x3f] }
 0xa5d   :  { %1050 = vmatpush.msra.mxu3 %v1405_v47  ;;  %v1433_v47 = vld [vmem:[%s2046_s11 + $0x48] sm:$0xff] }
 0xa60   :  { %1374 = vmatmul.msk.f32.gmra.mxu0 %vm166_vm8, %v656_v23  ;;  %v790_v28 = vpop.permute.xlu0 %789  ;;  %v1387_v23 = vld [vmem:[%s2041_s6 + $0x30] sm:$0xff] }
 0xa64   :  { %1384 = vmatmul.msk.f32.gmra.mxu3 %vm166_vm8, %v790_v28 }
 0xad5   :  { %v689_v29 = vpop.f32.mrf.mxu0 }
 0xad6   :  { %v690_v30 = vadd.f32 %v689_v29, %v1711_v60  ;;  %v784_v29 = vperm.slane %v1906_v27, 0 }
 0xad8   :  { %v695_v31 = vsel %vm166_vm8, %v690_v30, -inf }
 0xad9   :  { %696 = vmax.xlane.f32.xlu2 %v695_v31 }
 0xadd   :  { %v692_v32 = vpop.f32.mrf.mxu0 }
 0xade   :  { %v693_v33 = vadd.f32 %v692_v32, %v1718_v0 }
 0xadf   :  { %v820_v34 = vpop.f32.mrf.mxu3 }
 0xae0   :  { %v821_v35 = vadd.f32 %v820_v34, %v1711_v60  ;;  %v698_v36 = vsel %vm166_vm8, %v693_v33, -inf }
 0xae1   :  { %699 = vmax.xlane.f32.xlu1 %v698_v36 }
 0xae2   :  { %v826_v37 = vsel %vm166_vm8, %v821_v35, -inf }
 0xae3   :  { %827 = vmax.xlane.f32.xlu0 %v826_v37 }
 0xae7   :  { %v823_v38 = vpop.f32.mrf.mxu3 }
 0xae8   :  { %v824_v39 = vadd.f32 %v823_v38, %v1718_v0 }
 0xaea   :  { %v829_v40 = vsel %vm166_vm8, %v824_v39, -inf }
 0xaeb   :  { %830 = vmax.xlane.f32.xlu2 %v829_v40 }
 0xb03   :  { %1459 = vrot.lane.b32.xlu2 %v1458_v41, %s1579_s15 }
 0xb4c   :  { %v697_v42 = vpop.xlane.xlu2 %696 }
 0xb4d   :  { %v701_v43 = vsub.f32 %v690_v30, %v697_v42 }
 0xb4f   :  { %v703_v44 = vmul.f32 1.442695, %v701_v43 }
 0xb51   :  { %1508 = vpow2.f32 %v703_v44 }
 0xb54   :  { %v700_v60 = vpop.xlane.xlu1 %699 }
 0xb55   :  { %v702_v45 = vsub.f32 %v693_v33, %v700_v60 }
 0xb56   :  { %v828_v46 = vpop.xlane.xlu0 %827 }
 0xb57   :  { %v1509_v48 = vpop.eup %1508  ;;  %v705_v49 = vmul.f32 1.442695, %v702_v45  ;;  %v832_v50 = vsub.f32 %v821_v35, %v828_v46 }
 0xb58   :  { %v707_v51 = vsel %vm166_vm8, %v1509_v48, 0.0 }
 0xb59   :  { %1510 = vpow2.f32 %v705_v49  ;;  %v834_v0 = vmul.f32 1.442695, %v832_v50  ;;  %708 = vadd.xlane.f32.xlu1 %v707_v51  ;;  %v1393_v50 = vld [vmem:[%s2043_s8 + $0x30] sm:$0xff]  ;;  %v1392_v51 = vld [vmem:[%s2043_s8 + $0x28] sm:$0xff] }
 0xb5b   :  { %1512 = vpow2.f32 %v834_v0  ;;  %v1391_v0 = vld [vmem:[%s2043_s8 + $0x20] sm:$0xff] }
 0xb5e   :  { %v831_v53 = vpop.xlane.xlu2 %830 }
 0xb5f   :  { %v1511_v54 = vpop.eup %1510  ;;  %v833_v55 = vsub.f32 %v824_v39, %v831_v53 }
 0xb60   :  { %v710_v56 = vsel %vm166_vm8, %v1511_v54, 0.0 }
 0xb61   :  { %v1513_v57 = vpop.eup %1512  ;;  %v836_v58 = vmul.f32 1.442695, %v833_v55  ;;  %711 = vadd.xlane.f32.xlu0 %v710_v56 }
 0xb62   :  { %v838_v59 = vsel %vm166_vm8, %v1513_v57, 0.0 }
 0xb63   :  { %1514 = vpow2.f32 %v836_v58  ;;  %839 = vadd.xlane.f32.xlu1 %v838_v59 }
 0xb66   :  { %v1460_v61 = vpop.permute.xlu2 %1459 }
 0xb67   :  { %v1461_v62 = vunpack.i.l.bf16 %v1460_v61  ;;  %v1462_v1 = vunpack.i.h.bf16 %v1460_v61 }
 0xb69   :  { %v1515_v63 = vpop.eup %1514  ;;  %743 = vmatpush.msra.mxu1 %v1461_v62 }
 0xb6a   :  { %v841_v2 = vsel %vm166_vm8, %v1515_v63, 0.0 }
 0xb6b   :  { %842 = vadd.xlane.f32.xlu1 %v841_v2  ;;  %744 = vmatpush.msra.mxu1 %v1462_v1 }
 0xb6d   :  { %906 = vmatpush.msrb.mxu1 %v1388_v22  ;;  %v1404_v22 = vld [vmem:[%s2045_s10 + $0x70] sm:$0xff] }
 0xb6e   :  { %1051 = vmatpush.msra.mxu3 %v1404_v22 }
 0xb6f   :  { %907 = vmatpush.msrb.mxu1 %v1387_v23  ;;  %v1403_v23 = vld [vmem:[%s2045_s10 + $0x68] sm:$0xff] }
 0xb70   :  { %1052 = vmatpush.msra.mxu3 %v1403_v23  ;;  %v1124_v23 = vld [vmem:[%s2046_s11] sm:$0xff] }
 0xb75   :  { %1464 = vrot.lane.b32.xlu0 %v1458_v41, %s1582_s19 }
 0xbcc   :  { %v709_v3 = vpop.xlane.xlu1 %708 }
 0xbcd   :  { %1516 = vrcp.f32 %v709_v3 }
 0xbd3   :  { %v1517_v5 = vpop.eup %1516 }
 0xbd4   :  { %v715_v6 = vmul.f32 %v1517_v5, %v1509_v48  ;;  %v712_v7 = vpop.xlane.xlu0 %711 }
 0xbd5   :  { %1518 = vrcp.f32 %v712_v7 }
 0xbd6   :  { %1375 = vmatmul.msk.f32.vlgmr.msra.gmra.mxu1 %vm166_vm8, %v715_v6  ;;  %v840_v12 = vpop.xlane.xlu1 %839  ;;  %v963_v6 = vperm.slane %v1906_v27, 1 }
 0xbd7   :  { %1520 = vrcp.f32 %v840_v12 }
 0xbdb   :  { %v1519_v9 = vpop.eup %1518 }
 0xbdc   :  { %v716_v11 = vmul.f32 %v1519_v9, %v1511_v54 }
 0xbdd   :  { %v1521_v16 = vpop.eup %1520 }
 0xbde   :  { %1376 = vmatmul.msk.f32.gmra.mxu1 %vm166_vm8, %v716_v11  ;;  %v843_v13 = vpop.xlane.xlu1 %842  ;;  %v846_v19 = vmul.f32 %v1521_v16, %v1513_v57  ;;  %v966_v11 = vperm.slane %v1906_v27, 2 }
 0xbdf   :  { %1522 = vrcp.f32 %v843_v13 }
 0xbe5   :  { %v1523_v4 = vpop.eup %1522 }
 0xbe6   :  { %v847_v21 = vmul.f32 %v1523_v4, %v1515_v63 }
 0xbe7   :  { %v1465_v14 = vpop.permute.xlu0 %1464 }
 0xbe8   :  { %v1466_v17 = vunpack.i.l.bf16 %v1465_v14  ;;  %v1467_v18 = vunpack.i.h.bf16 %v1465_v14 }
 0xbea   :  { %874 = vmatpush.msrb.mxu0 %v1466_v17 }
 0xbec   :  { %875 = vmatpush.msrb.mxu0 %v1467_v18 }
 0xbed   :  { %1385 = vmatmul.msk.f32.vlgmr.msrb.gmra.mxu0 %vm166_vm8, %v846_v19 }
 0xbf5   :  { %1386 = vmatmul.msk.f32.gmra.mxu0 %vm166_vm8, %v847_v21 }
 0xc53   :  { %v746_v24 = vpop.f32.mrf.mxu1 }
 0xc54   :  { %1379 = vmatmul.msk.f32.vlgmr.msrb.gmra.mxu2 %vm166_vm8, %v746_v24  ;;  %v1402_v24 = vld [vmem:[%s2045_s10 + $0x60] sm:$0xff] }
 0xc55   :  { %1053 = vmatpush.msra.mxu3 %v1402_v24  ;;  %v1411_v24 = vld [vmem:[%s2046_s11 + $0x20] sm:$0xff] }
 0xc5b   :  { %v749_v25 = vpop.f32.mrf.mxu1 }
 0xc5c   :  { %1380 = vmatmul.msk.f32.gmra.mxu2 %vm166_vm8, %v749_v25  ;;  %v1401_v25 = vld [vmem:[%s2045_s10 + $0x58] sm:$0xff] }
 0xc5d   :  { %1054 = vmatpush.msra.mxu3 %v1401_v25  ;;  %v1432_v25 = vld [vmem:[%s2046_s11 + $0x40] sm:$0xff] }
 0xc6a   :  { %v877_v52 = vpop.f32.mrf.mxu0 }
 0xc6b   :  { %1389 = vmatmul.msk.f32.vlgmr.msrb.gmra.mxu1 %vm166_vm8, %v877_v52  ;;  %v1400_v52 = vld [vmem:[%s2045_s10 + $0x50] sm:$0xff] }
 0xc6c   :  { %1055 = vmatpush.msra.mxu3 %v1400_v52 }
 0xc72   :  { %v880_v26 = vpop.f32.mrf.mxu0 }
 0xc73   :  { %1390 = vmatmul.msk.f32.gmra.mxu1 %vm166_vm8, %v880_v26  ;;  %v1399_v26 = vld [vmem:[%s2045_s10 + $0x48] sm:$0xff] }
 0xc74   :  { %1056 = vmatpush.msra.mxu3 %v1399_v26 }
 0xcd7   :  { %v778_v28 = vpop.f32.mrf.mxu2 }
 0xcd8   :  { %v785_v30 = vadd.f32 %v784_v29, %v778_v28  ;;  %v1398_v28 = vld [vmem:[%s2045_s10 + $0x40] sm:$0xff]  ;;  %s1583_s10 = smov [#allocation6]  }
 0xcd9   :  { %1057 = vmatpush.msra.mxu3 %v1398_v28  ;;  %s1317_s6 = sshll.u32 %s1583_s10, 4  ;;  %s1318_s6 = int_to_ptr.vmem [resolvable:$true] %s1317_s6 }
 0xcdf   :  { %v781_v34 = vpop.f32.mrf.mxu2 }
 0xce0   :  { %v786_v36 = vadd.f32 %v784_v29, %v781_v34  ;;  %v1473_v29 = vld [vmem:[%s2044_s9 + $0x1] ss:$0 sm:$0xff] }
 0xce8   :  { %v909_v31 = vpop.f32.mrf.mxu1 }
 0xce9   :  { %v915_v32 = vadd.f32 %v909_v31, %v785_v30 }
 0xceb   :  { %v917_v33 = vadd.f32 %v915_v32, %v1844_v15 }
 0xced   :  { %v919_v35 = vsel %vm62_vm0, %v917_v33, 0.0 }
 0xcee   :  { %920 = vadd.xlane.f32.xlu1 %v919_v35 }
 0xcf0   :  { %v912_v37 = vpop.f32.mrf.mxu1 }
 0xcf1   :  { %v916_v38 = vadd.f32 %v912_v37, %v786_v36 }
 0xcf3   :  { %v918_v39 = vadd.f32 %v916_v38, %v1848_v20  ;;  %v1394_v20 = vld [vmem:[%s2043_s8 + $0x38] sm:$0xff] }
 0xcf4   :  { %997 = vmatpush.msra.mxu2 %v1394_v20 }
 0xcf5   :  { %v922_v40 = vsel %vm62_vm0, %v918_v39, 0.0 }
 0xcf6   :  { %923 = vadd.xlane.f32.xlu2 %v922_v40  ;;  %998 = vmatpush.msra.mxu2 %v1393_v50  ;;  %v1035_v50 = vperm.slane %v1906_v27, 3 }
 0xcf8   :  { %999 = vmatpush.msra.mxu2 %v1392_v51 }
 0xcfa   :  { %1000 = vmatpush.msra.mxu2 %v1391_v0 }
 0xd61   :  { %v921_v41 = vpop.xlane.xlu1 %920 }
 0xd62   :  { %v925_v42 = vmul.f32 %v921_v41, %v1665_v10 }
 0xd64   :  { %v927_v43 = vsub.f32 %v917_v33, %v925_v42 }
 0xd66   :  { %v929_v44 = vmul.f32 %v927_v43, %v927_v43 }
 0xd68   :  { %v931_v60 = vsel %vm62_vm0, %v929_v44, 0.0 }
 0xd69   :  { %932 = vadd.xlane.f32.xlu1 %v931_v60  ;;  %v924_v15 = vpop.xlane.xlu2 %923 }
 0xd6a   :  { %v926_v45 = vmul.f32 %v924_v15, %v1665_v10 }
 0xd6c   :  { %v928_v46 = vsub.f32 %v918_v39, %v926_v45 }
 0xd6e   :  { %v930_v48 = vmul.f32 %v928_v46, %v928_v46 }
 0xd70   :  { %v934_v49 = vsel %vm62_vm0, %v930_v48, 0.0 }
 0xd71   :  { %935 = vadd.xlane.f32.xlu0 %v934_v49 }
 0xddc   :  { %v933_v53 = vpop.xlane.xlu1 %932 }
 0xddd   :  { %v937_v54 = vmul.f32 %v933_v53, %v1665_v10 }
 0xddf   :  { %v939_v55 = vadd.f32 1e-12, %v937_v54 }
 0xde1   :  { %1524 = vrsqrt.f32 %v939_v55  ;;  %vm947_vm8 = vweird.f32 %v939_v55 }
 0xde4   :  { %v936_v56 = vpop.xlane.xlu0 %935 }
 0xde5   :  { %v938_v57 = vmul.f32 %v936_v56, %v1665_v10 }
 0xde7   :  { %v1525_v58 = vpop.eup %1524  ;;  %v940_v59 = vadd.f32 1e-12, %v938_v57 }
 0xde8   :  { %v942_v61 = vmul.f32 %v1525_v58, %v939_v55  ;;  %vm948_vm7 = vweird.f32 %v1525_v58 }
 0xde9   :  { %1526 = vrsqrt.f32 %v940_v59  ;;  %vm949_vm9 = vmor %vm947_vm8, %vm948_vm7  ;;  %vm957_vm11 = vweird.f32 %v940_v59 }
 0xdea   :  { %v943_v62 = vmul.f32 %v1525_v58, %v942_v61 }
 0xdec   :  { %v944_v63 = vmul.f32 0.5, %v943_v62 }
 0xdee   :  { %v945_v1 = vsub.f32 1.5, %v944_v63 }
 0xdef   :  { %v1527_v2 = vpop.eup %1526 }
 0xdf0   :  { %v946_v3 = vmul.f32 %v1525_v58, %v945_v1  ;;  %v952_v5 = vmul.f32 %v1527_v2, %v940_v59  ;;  %vm958_vm10 = vweird.f32 %v1527_v2 }
 0xdf1   :  { %vm959_vm12 = vmor %vm957_vm11, %vm958_vm10 }
 0xdf2   :  { %v950_v7 = vsel %vm949_vm9, %v1525_v58, %v946_v3  ;;  %v953_v8 = vmul.f32 %v1527_v2, %v952_v5 }
 0xdf3   :  { %v961_v9 = vmul.f32 %v950_v7, %v927_v43 }
 0xdf4   :  { %v954_v12 = vmul.f32 0.5, %v953_v8 }
 0xdf5   :  { %v964_v13 = vmul.f32 %v963_v6, %v961_v9 }
 0xdf6   :  { %v955_v14 = vsub.f32 1.5, %v954_v12  ;;  %v1127_v12 = vld [vmem:[%s2046_s11 + $0x18] sm:$0xff] }
 0xdf7   :  { %v967_v16 = vadd.f32 %v966_v11, %v964_v13  ;;  %v1414_v13 = vld [vmem:[%s2046_s11 + $0x38] sm:$0xff]  ;;  %1143 = vmatpush.msra.mxu0 %v1127_v12 }
 0xdf8   :  { %v956_v17 = vmul.f32 %v1527_v2, %v955_v14  ;;  %v1435_v14 = vld [vmem:[%s2046_s11 + $0x58] sm:$0xff]  ;;  %1174 = vmatpush.msra.mxu1 %v1414_v13  ;;  %1271 = vmatpush.msrb.mxu2 %v1414_v13 }
 0xdf9   :  { %1396 = vmatmul.msk.f32.vlgmr.msra.gmra.mxu2 %vm62_vm0, %v967_v16  ;;  %1302 = vmatpush.msrb.mxu3 %v1435_v14 }
 0xdfa   :  { %v960_v18 = vsel %vm959_vm12, %v1527_v2, %v956_v17  ;;  %v1413_v17 = vld [vmem:[%s2046_s11 + $0x30] sm:$0xff] }
 0xdfb   :  { %v962_v19 = vmul.f32 %v960_v18, %v928_v46  ;;  %v1434_v18 = vld [vmem:[%s2046_s11 + $0x50] sm:$0xff]  ;;  %1175 = vmatpush.msra.mxu1 %v1413_v17  ;;  %1272 = vmatpush.msrb.mxu2 %v1413_v17 }
 0xdfc   :  { %1303 = vmatpush.msrb.mxu3 %v1434_v18 }
 0xdfd   :  { %v965_v4 = vmul.f32 %v963_v6, %v962_v19  ;;  %v1125_v19 = vld [vmem:[%s2046_s11 + $0x8] sm:$0xff] }
 0xdfe   :  { %1304 = vmatpush.msrb.mxu3 %v1433_v47 }
 0xdff   :  { %v968_v21 = vadd.f32 %v966_v11, %v965_v4  ;;  %v1412_v4 = vld [vmem:[%s2046_s11 + $0x28] sm:$0xff] }
 0xe00   :  { %1176 = vmatpush.msra.mxu1 %v1412_v4  ;;  %1273 = vmatpush.msrb.mxu2 %v1412_v4 }
 0xe01   :  { %1397 = vmatmul.msk.f32.gmra.mxu2 %vm62_vm0, %v968_v21  ;;  %1305 = vmatpush.msrb.mxu3 %v1432_v25 }
 0xe02   :  { %1177 = vmatpush.msra.mxu1 %v1411_v24  ;;  %1274 = vmatpush.msrb.mxu2 %v1411_v24 }
 0xe04   :  { %1241 = vmatpush.msrb.mxu1 %v1127_v12 }
 0xe7c   :  { %v1002_v30 = vpop.f32.mrf.mxu2 }
 0xe7d   :  { %v1003_v31 = vadd.f32 %v1473_v29, %v1002_v30 }
 0xe7f   :  { %v1008_v32 = vmul.f32 %v1003_v31, %v1003_v31 }
 0xe81   :  { %v1010_v33 = vmul.f32 %v1008_v32, %v1003_v31 }
 0xe83   :  { %v1012_v34 = vmul.f32 0.044715, %v1010_v33 }
 0xe84   :  { %v1005_v35 = vpop.f32.mrf.mxu2 }
 0xe85   :  { %v1014_v36 = vadd.f32 %v1012_v34, %v1003_v31  ;;  %v1006_v37 = vadd.f32 %v1473_v29, %v1005_v35  ;;  %v1111_v34 = vperm.slane %v1906_v27, 4 }
 0xe87   :  { %v1016_v38 = vmul.f32 0.7978846, %v1014_v36  ;;  %v1009_v39 = vmul.f32 %v1006_v37, %v1006_v37 }
 0xe89   :  { %1528 = vtanh.f32 %v1016_v38  ;;  %v1011_v40 = vmul.f32 %v1009_v39, %v1006_v37 }
 0xe8b   :  { %v1013_v41 = vmul.f32 0.044715, %v1011_v40 }
 0xe8d   :  { %v1015_v42 = vadd.f32 %v1013_v41, %v1006_v37 }
 0xe8f   :  { %v1529_v43 = vpop.eup %1528  ;;  %v1017_v44 = vmul.f32 0.7978846, %v1015_v42 }
 0xe90   :  { %v1020_v60 = vadd.f32 1.0, %v1529_v43 }
 0xe91   :  { %1530 = vtanh.f32 %v1017_v44 }
 0xe92   :  { %v1022_v15 = vmul.f32 0.5, %v1020_v60 }
 0xe94   :  { %v1024_v45 = vmul.f32 %v1022_v15, %v1003_v31 }
 0xe96   :  { %1406 = vmatmul.msk.f32.vlgmr.msra.gmra.mxu3 %vm535_vm15, %v1024_v45 }
 0xe97   :  { %v1531_v46 = vpop.eup %1530 }
 0xe98   :  { %v1021_v48 = vadd.f32 1.0, %v1531_v46 }
 0xe9a   :  { %v1023_v49 = vmul.f32 0.5, %v1021_v48 }
 0xe9c   :  { %v1025_v20 = vmul.f32 %v1023_v49, %v1006_v37  ;;  %v1114_v37 = vperm.slane %v1906_v27, 5 }
 0xe9e   :  { %1407 = vmatmul.msk.f32.gmra.mxu3 %vm535_vm15, %v1025_v20 }
 0xf19   :  { %v1059_v51 = vpop.f32.mrf.mxu3 }
 0xf1a   :  { %v1060_v0 = vadd.f32 %v1059_v51, %v1035_v50  ;;  %v1119_v51 = vld [vmem:[%s2047_s12] sm:$0x1] }
 0xf1c   :  { %v1065_v53 = vadd.f32 %v1060_v0, %v967_v16  ;;  %v1126_v16 = vld [vmem:[%s2046_s11 + $0x10] sm:$0xff]  ;;  %s1120_s11 = sld [smem:[#allocation3]] }
 0xf1d   :  { %1144 = vmatpush.msra.mxu0 %v1126_v16  ;;  %1242 = vmatpush.msrb.mxu1 %v1126_v16 }
 0xf1e   :  { %v1067_v54 = vsel %vm62_vm0, %v1065_v53, 0.0 }
 0xf1f   :  { %1068 = vadd.xlane.f32.xlu1 %v1067_v54  ;;  %1145 = vmatpush.msra.mxu0 %v1125_v19 }
 0xf20   :  { %1243 = vmatpush.msrb.mxu1 %v1125_v19 }
 0xf21   :  { %v1062_v55 = vpop.f32.mrf.mxu3  ;;  %1146 = vmatpush.msra.mxu0 %v1124_v23 }
 0xf22   :  { %v1063_v56 = vadd.f32 %v1062_v55, %v1035_v50  ;;  %1244 = vmatpush.msrb.mxu1 %v1124_v23  ;;  %s1437_s30 = scalar_lea.vmem [#allocation2], %s1120_s11 }
 0xf23   :  { %1206 = vmatpush.msrb.mxu0 %v1435_v14 }
 0xf24   :  { %v1066_v57 = vadd.f32 %v1063_v56, %v968_v21 }
 0xf25   :  { %1207 = vmatpush.msrb.mxu0 %v1434_v18 }
 0xf26   :  { %v1070_v58 = vsel %vm62_vm0, %v1066_v57, 0.0 }
 0xf27   :  { %1071 = vadd.xlane.f32.xlu1 %v1070_v58  ;;  %1208 = vmatpush.msrb.mxu0 %v1433_v47 }
 0xf29   :  { %1209 = vmatpush.msrb.mxu0 %v1432_v25 }
 0xf92   :  { %v1069_v59 = vpop.xlane.xlu1 %1068 }
 0xf93   :  { %v1073_v61 = vmul.f32 %v1069_v59, %v1665_v10 }
 0xf95   :  { %v1968_v62 = vsub.f32 %v1065_v53, %v1073_v61 }
 0xf97   :  { %v1077_v63 = vmul.f32 %v1968_v62, %v1968_v62 }
 0xf99   :  { %v1079_v1 = vsel %vm62_vm0, %v1077_v63, 0.0 }
 0xf9a   :  { %1080 = vadd.xlane.f32.xlu1 %v1079_v1  ;;  %v1072_v2 = vpop.xlane.xlu1 %1071 }
 0xf9b   :  { %v1074_v3 = vmul.f32 %v1072_v2, %v1665_v10 }
 0xf9d   :  { %v1974_v5 = vsub.f32 %v1066_v57, %v1074_v3 }
 0xf9f   :  { %v1078_v6 = vmul.f32 %v1974_v5, %v1974_v5 }
 0xfa1   :  { %v1082_v7 = vsel %vm62_vm0, %v1078_v6, 0.0 }
 0xfa2   :  { %1083 = vadd.xlane.f32.xlu1 %v1082_v7 }
0x100d   :  { %v1081_v8 = vpop.xlane.xlu1 %1080 }
0x100e   :  { %v1085_v9 = vmul.f32 %v1081_v8, %v1665_v10 }
0x1010   :  { %v1087_v11 = vadd.f32 1e-12, %v1085_v9 }
0x1012   :  { %1532 = vrsqrt.f32 %v1087_v11  ;;  %vm1095_vm14 = vweird.f32 %v1087_v11 }
0x1015   :  { %v1084_v21 = vpop.xlane.xlu1 %1083 }
0x1016   :  { %v1086_v22 = vmul.f32 %v1084_v21, %v1665_v10 }
0x1018   :  { %v1533_v52 = vpop.eup %1532  ;;  %v1088_v26 = vadd.f32 1e-12, %v1086_v22 }
0x1019   :  { %v1090_v10 = vmul.f32 %v1533_v52, %v1087_v11  ;;  %vm1096_vm13 = vweird.f32 %v1533_v52 }
0x101a   :  { %1534 = vrsqrt.f32 %v1088_v26  ;;  %vm1097_vm15 = vmor %vm1095_vm14, %vm1096_vm13  ;;  %vm1105_vm2 = vweird.f32 %v1088_v26 }
0x101b   :  { %v1091_v28 = vmul.f32 %v1533_v52, %v1090_v10 }
0x101d   :  { %v1092_v29 = vmul.f32 0.5, %v1091_v28 }
0x101f   :  { %v1093_v30 = vsub.f32 1.5, %v1092_v29 }
0x1020   :  { %v1535_v31 = vpop.eup %1534 }
0x1021   :  { %v1094_v32 = vmul.f32 %v1533_v52, %v1093_v30  ;;  %v1100_v33 = vmul.f32 %v1535_v31, %v1088_v26  ;;  %vm1106_vm1 = vweird.f32 %v1535_v31 }
0x1022   :  { %vm1107_vm3 = vmor %vm1105_vm2, %vm1106_vm1 }
0x1023   :  { %v1098_v35 = vsel %vm1097_vm15, %v1533_v52, %v1094_v32  ;;  %v1101_v36 = vmul.f32 %v1535_v31, %v1100_v33 }
0x1024   :  { %v1109_v38 = vmul.f32 %v1098_v35, %v1968_v62 }
0x1025   :  { %v1102_v39 = vmul.f32 0.5, %v1101_v36 }
0x1026   :  { %v1112_v40 = vmul.f32 %v1111_v34, %v1109_v38 }
0x1027   :  { %v1103_v41 = vsub.f32 1.5, %v1102_v39 }
0x1028   :  { %v1115_v42 = vadd.f32 %v1114_v37, %v1112_v40 }
0x1029   :  { %v1104_v43 = vmul.f32 %v1535_v31, %v1103_v41 }
0x102a   :  { %1117 = vst.msk [vmem:[#allocation2] sm:$0xff] %vm62_vm0, %v1115_v42 }
0x102b   :  { %v1108_v44 = vsel %vm1107_vm3, %v1535_v31, %v1104_v43 }
0x102c   :  { %v1110_v60 = vmul.f32 %v1108_v44, %v1974_v5 }
0x102e   :  { %v1113_v15 = vmul.f32 %v1111_v34, %v1110_v60 }
0x1030   :  { %v1116_v45 = vadd.f32 %v1114_v37, %v1113_v15 }
0x1032   :  { %1118 = vst.msk [vmem:[#allocation2 + $0x8] sm:$0xff] %vm62_vm0, %v1116_v45 }
0x1039   :  { %v1439_v27 = vld [vmem:[%s1437_s30 - $0x1] sm:$0x1]  ;;  %v1153_v46 = vld [vmem:[%s1437_s30] sm:$0x1]  ;;  %v1425_v48 = vld [vmem:[%s1333_s14 + $0x8] sm:$0x1] }
0x103a   :  { %1410 = vmatmul.msk.f32.vlgmr.msra.gmra.mxu0 %vm62_vm0, %v1439_v27  ;;  %1415 = vmatmul.msk.f32.vlgmr.msra.gmra.mxu1 %vm62_vm0, %v1153_v46  ;;  %v1431_v49 = vld [vmem:[%s1333_s14 + $0x9] sm:$0x1]  ;;  %v1416_v20 = vld [vmem:[%s1437_s30 + $0x1] sm:$0x1]  ;;  %v1423_v50 = vld [vmem:[%s1333_s14 + $0x7] sm:$0x1] }
0x103b   :  { %1430 = vmatmul.msk.f32.vlgmr.msrb.gmra.mxu2 %vm62_vm0, %v1425_v48  ;;  %1436 = vmatmul.msk.f32.vlgmr.msrb.gmra.mxu3 %vm62_vm0, %v1431_v49 }
0x1042   :  { %1421 = vmatmul.msk.f32.vlgmr.msrb.gmra.mxu0 %vm62_vm0, %v1416_v20  ;;  %1424 = vmatmul.msk.f32.vlgmr.msrb.gmra.mxu1 %vm62_vm0, %v1423_v50 }
0x10b7   :  { %v1148_v0 = vpop.f32.mrf.mxu0  ;;  %v1179_v53 = vpop.f32.mrf.mxu1 }
0x10b8   :  { %v1151_v54 = vadd.f32 %v1148_v0, %v1119_v51 }
0x10ba   :  { %v1182_v55 = vadd.f32 %v1179_v53, %v1151_v54 }
0x10be   :  { %v1276_v61 = vpop.f32.mrf.mxu2  ;;  %v1307_v63 = vpop.f32.mrf.mxu3 }
0x10bf   :  { %v1211_v56 = vpop.f32.mrf.mxu0  ;;  %v1246_v57 = vpop.f32.mrf.mxu1 }
0x10c0   :  { %v1214_v58 = vadd.f32 %v1211_v56, %v1182_v55  ;;  %v1249_v59 = vadd.f32 %v1246_v57, %v1119_v51 }
0x10c2   :  { %1216 = vst.msk [vmem:[#allocation6] sm:$0x1] %vm1215_vm4, %v1214_v58  ;;  %v1279_v62 = vadd.f32 %v1276_v61, %v1249_v59 }
0x10c4   :  { %v1310_v1 = vadd.f32 %v1307_v63, %v1279_v62 }
0x10c6   :  { %1311 = vst.msk [vmem:[#allocation6 + $0x1] sm:$0x1] %vm1215_vm4, %v1310_v1 }
0x10c7   :  { %1322 = dma.vmem_to_hbm [thread:$0]  %s1318_s6, 32, %s1320_s17, [#allocation4]  }
0x10c8   :  { %1574 = dma.done.wait [#allocation4], 32  }
0x10c9   :  { %1575 = vsyncadd [#allocation4], 4294967264 }
0x10ca   :  { %1327 = vsyncpa [#allocation4], 1 }
0x10cb   :  { %1328 = vsyncpa [#allocation5], 1 }

</bundles_post_ra>
